<compile_context>
chip_gen: v7x
topology: tpu7x:2x2x1
jax: 0.10.0
libtpu: 0.0.40
codegen_flags: <defaults>
</compile_context>

<pallas_src>
import math

import jax
import jax.numpy as jnp
from jax.experimental import pallas as pl
from jax.experimental.pallas import tpu as pltpu

# ---- static model dims (small synthetic config) ----
B, L, D = 2, 8, 32          # batch, seq len, d_model
H = 4                       # attention heads
HD = D // H                 # head dim
D_INNER = 2 * D             # mamba inner dim (64)
D_STATE = 8                 # mamba SSM state dim
D_CONV = 4                  # mamba conv kernel size
DT_RANK = math.ceil(D / 16) # mamba dt rank (= 2)
EPS = 1e-5                  # LayerNorm eps (PyTorch default)
NTOK = B * L                # folded token count (16)
LANES = B * D_INNER         # 128 lanes: both batches stacked in one f32 vreg

# ---- packed parameter slab layout (row offsets) ----
# width-D (32) slab
R_WQ, R_WK, R_WV, R_WO = 0, D, 2 * D, 3 * D
R_WOUT = 4 * D                          # D_INNER rows
R_BQ  = 4 * D + D_INNER                 # 1-row params, pre-broadcast to NTOK rows
R_BK  = R_BQ + NTOK
R_BV  = R_BK + NTOK
R_BO  = R_BV + NTOK
R_G1  = R_BO + NTOK
R_BE1 = R_G1 + NTOK
R_G2  = R_BE1 + NTOK
R_BE2 = R_G2 + NTOK
W32_ROWS = R_BE2 + NTOK                 # 320

# width-D_INNER (64) slab
R_ALOG   = 0                            # (D_STATE, D_INNER)
R_WDELTA = R_ALOG + D_STATE             # (D_INNER, D_INNER) = wx[:, :dt_rank] @ wdt
R_CONVW  = R_WDELTA + D_INNER           # D_CONV taps, each pre-broadcast to NTOK rows
R_CONVB  = R_CONVW + D_CONV * NTOK
R_BDT    = R_CONVB + NTOK
R_DPAR   = R_BDT + NTOK
W64_ROWS = R_DPAR + NTOK                # 184


def _layernorm(x, g, b):
    mu = jnp.mean(x, axis=-1, keepdims=True)
    var = jnp.mean((x - mu) ** 2, axis=-1, keepdims=True)
    return (x - mu) * jax.lax.rsqrt(var + EPS) * g + b


def _softplus(x):
    return jnp.maximum(x, 0.0) + jnp.log1p(jnp.exp(-jnp.abs(x)))


def _silu(x):
    return x * jax.nn.sigmoid(x)


def am_layer_kernel(x_ref, w32_ref, w64_ref, win_ref, wbc_ref, out_ref, hs_scr):
    x = x_ref[...]                                      # (NTOK, D) batch-major tokens

    # pre-broadcast 1-row params: plain aligned vector loads (no XLU broadcasts)
    def p32(r):
        return w32_ref[r:r + NTOK, :]

    def p64(r):
        return w64_ref[r:r + NTOK, :]

    # ---------------- multi-head self-attention (all tokens at once) -------
    scale = 1.0 / math.sqrt(HD)
    q = jnp.dot(x, w32_ref[R_WQ:R_WQ + D, :], preferred_element_type=jnp.float32) + p32(R_BQ)
    k = jnp.dot(x, w32_ref[R_WK:R_WK + D, :], preferred_element_type=jnp.float32) + p32(R_BK)
    v = jnp.dot(x, w32_ref[R_WV:R_WV + D, :], preferred_element_type=jnp.float32) + p32(R_BV)
    q3 = q.reshape(B, L, D)
    k3 = k.reshape(B, L, D)
    v3 = v.reshape(B, L, D)

    o_proj = jnp.zeros((NTOK, D), jnp.float32)
    for h in range(H):                                  # short static unroll over heads
        sl = slice(h * HD, (h + 1) * HD)
        s = jnp.einsum("bld,bsd->bls", q3[:, :, sl], k3[:, :, sl],
                       preferred_element_type=jnp.float32) * scale
        s = s - jnp.max(s, axis=-1, keepdims=True)
        p = jnp.exp(s)
        p = p * pl.reciprocal(jnp.sum(p, axis=-1, keepdims=True), approx=False)
        ctx = jnp.einsum("bls,bsd->bld", p, v3[:, :, sl],
                         preferred_element_type=jnp.float32).reshape(NTOK, HD)
        # fold the head straight through its slice of W_o: no lane concatenate
        wo_h = w32_ref[R_WO + h * HD:R_WO + (h + 1) * HD, :]
        o_proj = o_proj + jnp.dot(ctx, wo_h, preferred_element_type=jnp.float32)
    attn = o_proj + p32(R_BO)

    x1 = _layernorm(x + attn, p32(R_G1), p32(R_BE1))    # residual + norm1 (dropout = id)

    # --------------------------- Mamba block -------------------------------
    # single full-128-lane in-projection, then slice xm / z
    xz = jnp.dot(x1, win_ref[...], preferred_element_type=jnp.float32)   # (NTOK, 2*D_INNER)
    xm0 = xz[:, :D_INNER]
    z = xz[:, D_INNER:]

    # causal depthwise conv1d: one zero pad + shifted slices + per-batch mask
    xpad = jnp.concatenate(
        [jnp.zeros((D_CONV - 1, D_INNER), jnp.float32), xm0], axis=0)
    seq_pos = jax.lax.broadcasted_iota(jnp.int32, (NTOK, 1), 0) & (L - 1)  # pos mod L (L pow2)
    conv = xm0 * p64(R_CONVW + (D_CONV - 1) * NTOK)     # zero-shift tap
    for kk in range(D_CONV - 1):
        sft = (D_CONV - 1) - kk
        shifted = xpad[kk:kk + NTOK, :]                 # row r -> xm0[r - sft] (0 padded)
        shifted = jnp.where(seq_pos >= sft, shifted, 0.0)   # no cross-batch leakage
        conv = conv + shifted * p64(R_CONVW + kk * NTOK)
    xm = _silu(conv + p64(R_CONVB))

    # input-dependent SSM parameters: folded delta weight + lane-0-aligned B/C
    delta = _softplus(
        jnp.dot(xm, w64_ref[R_WDELTA:R_WDELTA + D_INNER, :],
                preferred_element_type=jnp.float32) + p64(R_BDT))          # (NTOK, D_INNER)
    Bm = jnp.dot(xm, wbc_ref[:D_INNER, :], preferred_element_type=jnp.float32)   # (NTOK, D_STATE)
    Cm = jnp.dot(xm, wbc_ref[D_INNER:, :], preferred_element_type=jnp.float32)   # (NTOK, D_STATE)
    A = -jnp.exp(w64_ref[R_ALOG:R_ALOG + D_STATE, :])                      # (D_STATE, D_INNER)

    # ---- selective scan: batch-stacked along lanes, everything hoisted ----
    u = delta * xm                                                          # (NTOK, D_INNER)
    delta_lane = jnp.concatenate([delta[:L, :], delta[L:, :]], axis=1)      # (L, LANES)
    a_lane = jnp.concatenate([A, A], axis=1)                                # (D_STATE, LANES)
    decay = jnp.exp(delta_lane[:, None, :] * a_lane[None, :, :])            # (L, D_STATE, LANES)
    bu_tok = Bm[:, :, None] * u[:, None, :]                                 # (NTOK, D_STATE, D_INNER)
    bu = jnp.concatenate([bu_tok[:L], bu_tok[L:]], axis=2)                  # (L, D_STATE, LANES)

    hstate = jnp.zeros((D_STATE, LANES), jnp.float32)                       # one f32 vreg
    for t in range(L):                                   # serial chain: L=8 full-vreg FMAs
        hstate = decay[t] * hstate + bu[t]
        hs_scr[t] = hstate                               # aligned (8,128) store, off the chain

    # y readout for all tokens at once (outside the recurrence)
    hs_all = hs_scr[...]                                                    # (L, D_STATE, LANES)
    hs_tok = jnp.concatenate(
        [hs_all[:, :, :D_INNER], hs_all[:, :, D_INNER:]], axis=0)           # (NTOK, D_STATE, D_INNER)
    y_ssm = jnp.sum(Cm[:, :, None] * hs_tok, axis=1)                        # (NTOK, D_INNER)

    y = (y_ssm + p64(R_DPAR) * xm) * _silu(z)
    mamba_out = jnp.dot(y, w32_ref[R_WOUT:R_WOUT + D_INNER, :],
                        preferred_element_type=jnp.float32)

    out_ref[...] = _layernorm(x1 + mamba_out, p32(R_G2), p32(R_BE2))        # residual + norm2


def make_params(key):
    ks = jax.random.split(key, 10)
    n = lambda k, shape, s=0.1: jax.random.normal(k, shape, jnp.float32) * s
    p = {
        "wq": n(ks[0], (D, D)), "bq": jnp.zeros((1, D), jnp.float32),
        "wk": n(ks[1], (D, D)), "bk": jnp.zeros((1, D), jnp.float32),
        "wv": n(ks[2], (D, D)), "bv": jnp.zeros((1, D), jnp.float32),
        "wo": n(ks[3], (D, D)), "bo": jnp.zeros((1, D), jnp.float32),
        "g1": jnp.ones((1, D), jnp.float32), "be1": jnp.zeros((1, D), jnp.float32),
        "win": n(ks[4], (D, 2 * D_INNER)),
        "convw": n(ks[5], (D_CONV, D_INNER), 0.2),
        "convb": jnp.zeros((1, D_INNER), jnp.float32),
        "wx": n(ks[6], (D_INNER, DT_RANK + 2 * D_STATE)),
        "wdt": n(ks[7], (DT_RANK, D_INNER)),
        "bdt": jnp.full((1, D_INNER), 0.1, jnp.float32),
        # A_log stored transposed as (d_state, d_inner); standard S4D-real init
        "alog": jnp.tile(
            jnp.log(jnp.arange(1, D_STATE + 1, dtype=jnp.float32))[:, None],
            (1, D_INNER)),
        "dpar": jnp.ones((1, D_INNER), jnp.float32),
        "wout": n(ks[8], (D_INNER, D)),
        "g2": jnp.ones((1, D), jnp.float32), "be2": jnp.zeros((1, D), jnp.float32),
    }
    return p


def _pack_params(p):
    """Pack parameters into DMA-friendly slabs; pre-broadcast 1-row params."""
    bc_d = lambda a: jnp.broadcast_to(a, (NTOK, D))
    bc_i = lambda a: jnp.broadcast_to(a, (NTOK, D_INNER))
    w32 = jnp.concatenate(
        [p["wq"], p["wk"], p["wv"], p["wo"], p["wout"],
         bc_d(p["bq"]), bc_d(p["bk"]), bc_d(p["bv"]), bc_d(p["bo"]),
         bc_d(p["g1"]), bc_d(p["be1"]), bc_d(p["g2"]), bc_d(p["be2"])],
        axis=0)                                                    # (320, D)
    w_delta = p["wx"][:, :DT_RANK] @ p["wdt"]                      # fold rank-2 dt matmul
    conv_taps = [bc_i(p["convw"][kk:kk + 1, :]) for kk in range(D_CONV)]
    w64 = jnp.concatenate(
        [p["alog"], w_delta] + conv_taps +
        [bc_i(p["convb"]), bc_i(p["bdt"]), bc_i(p["dpar"])], axis=0)   # (184, D_INNER)
    wbc = jnp.concatenate(
        [p["wx"][:, DT_RANK:DT_RANK + D_STATE],
         p["wx"][:, DT_RANK + D_STATE:]], axis=0)                  # (2*D_INNER, D_STATE)
    return w32, w64, p["win"], wbc


def am_layer(x, p):
    w32, w64, win, wbc = _pack_params(p)
    x2 = x.reshape(NTOK, D)   # fold batch into tokens (layout plumbing, outside kernel)
    out = pl.pallas_call(
        am_layer_kernel,
        out_shape=jax.ShapeDtypeStruct((NTOK, D), jnp.float32),
        grid=(1,),
        in_specs=[
            pl.BlockSpec((NTOK, D), lambda i: (0, 0)),
            pl.BlockSpec((W32_ROWS, D), lambda i: (0, 0)),
            pl.BlockSpec((W64_ROWS, D_INNER), lambda i: (0, 0)),
            pl.BlockSpec((D, 2 * D_INNER), lambda i: (0, 0)),
            pl.BlockSpec((2 * D_INNER, D_STATE), lambda i: (0, 0)),
        ],
        out_specs=pl.BlockSpec((NTOK, D), lambda i: (0, 0)),
        scratch_shapes=[pltpu.VMEM((L, D_STATE, LANES), jnp.float32)],
        compiler_params=pltpu.CompilerParams(dimension_semantics=("arbitrary",)),
    )(x2, w32, w64, win, wbc)
    return out.reshape(B, L, D)


# ---------------- pure-JAX reference (for correctness check) ----------------
def ref_forward_single(x, p):
    q = x @ p["wq"] + p["bq"]
    k = x @ p["wk"] + p["bk"]
    v = x @ p["wv"] + p["bv"]
    scale = 1.0 / math.sqrt(HD)
    ctx = []
    for h in range(H):
        sl = slice(h * HD, (h + 1) * HD)
        s = (q[:, sl] @ k[:, sl].T) * scale
        pr = jax.nn.softmax(s, axis=-1)
        ctx.append(pr @ v[:, sl])
    attn = jnp.concatenate(ctx, axis=-1) @ p["wo"] + p["bo"]
    x1 = _layernorm(x + attn, p["g1"], p["be1"])

    xz = x1 @ p["win"]
    xm, z = xz[:, :D_INNER], xz[:, D_INNER:]
    conv = jnp.zeros_like(xm)
    for kk in range(D_CONV):
        off = kk - (D_CONV - 1)
        shifted = xm if off == 0 else jnp.concatenate(
            [jnp.zeros((-off, D_INNER), jnp.float32), xm[:L + off, :]], axis=0)
        conv = conv + shifted * p["convw"][kk:kk + 1, :]
    xm = _silu(conv + p["convb"])
    x_dbl = xm @ p["wx"]
    delta = _softplus(x_dbl[:, :DT_RANK] @ p["wdt"] + p["bdt"])
    Bm = x_dbl[:, DT_RANK:DT_RANK + D_STATE]
    Cm = x_dbl[:, DT_RANK + D_STATE:]
    A = -jnp.exp(p["alog"])
    hs = jnp.zeros((D_STATE, D_INNER), jnp.float32)
    ys = []
    for l in range(L):
        d_l, x_l = delta[l:l + 1, :], xm[l:l + 1, :]
        hs = jnp.exp(d_l * A) * hs + Bm[l:l + 1, :].T * (d_l * x_l)
        ys.append(Cm[l:l + 1, :] @ hs + p["dpar"] * x_l)
    y = jnp.concatenate(ys, axis=0) * _silu(z)
    mamba_out = y @ p["wout"]
    return _layernorm(x1 + mamba_out, p["g2"], p["be2"])


if __name__ == "__main__":
    key = jax.random.PRNGKey(0)
    kx, kp = jax.random.split(key)
    x = jax.random.normal(kx, (B, L, D), jnp.float32)
    params = make_params(kp)

    out = am_layer(x, params)
    out = jax.block_until_ready(out)

    ref = jax.vmap(lambda xb: ref_forward_single(xb, params))(x)
    assert out.shape == (B, L, D)
    err = float(jnp.max(jnp.abs(out - ref)))
    assert jnp.allclose(out, ref, atol=1e-3, rtol=1e-3), f"max abs err {err}"
    print("KERNEL_OK")
</pallas_src>

<mosaic_0001>
module attributes {stable_mosaic.version = 11 : i64} {
  func.func @am_layer_kernel(%arg0: i32, %arg1: memref<16x32xf32, #tpu.memory_space<vmem>>, %arg2: memref<320x32xf32, #tpu.memory_space<vmem>>, %arg3: memref<184x64xf32, #tpu.memory_space<vmem>>, %arg4: memref<32x128xf32, #tpu.memory_space<vmem>>, %arg5: memref<128x8xf32, #tpu.memory_space<vmem>>, %arg6: memref<16x32xf32, #tpu.memory_space<vmem>>, %arg7: memref<8x8x128xf32, #tpu.memory_space<vmem>>) attributes {dimension_semantics = [#tpu.dimension_semantics<arbitrary>], iteration_bounds = array<i64: 1>, scalar_prefetch = 0 : i64, scratch_operands = 1 : i64, tpu.core_type = #tpu.core_type<tc>, window_params = [{pipeline_mode = #tpu.pipeline_mode<synchronous>, transform_indices = @transform_0, window_bounds = array<i64: 16, 32>}, {pipeline_mode = #tpu.pipeline_mode<synchronous>, transform_indices = @transform_1, window_bounds = array<i64: 320, 32>}, {pipeline_mode = #tpu.pipeline_mode<synchronous>, transform_indices = @transform_2, window_bounds = array<i64: 184, 64>}, {pipeline_mode = #tpu.pipeline_mode<synchronous>, transform_indices = @transform_3, window_bounds = array<i64: 32, 128>}, {pipeline_mode = #tpu.pipeline_mode<synchronous>, transform_indices = @transform_4, window_bounds = array<i64: 128, 8>}, {pipeline_mode = #tpu.pipeline_mode<synchronous>, transform_indices = @transform_5, window_bounds = array<i64: 16, 32>}]} {
    %c0 = arith.constant 0 : index
    %c0_0 = arith.constant 0 : index
    %0 = vector.load %arg1[%c0, %c0_0] : memref<16x32xf32, #tpu.memory_space<vmem>>, vector<16x32xf32>
    %c0_1 = arith.constant 0 : index
    %c0_2 = arith.constant 0 : index
    %1 = vector.load %arg2[%c0_1, %c0_2] : memref<320x32xf32, #tpu.memory_space<vmem>>, vector<32x32xf32>
    %cst = arith.constant dense<0.000000e+00> : vector<16x32xf32>
    %2 = tpu.matmul %0, %1, %cst {dimension_numbers = #tpu.dot_dimension_numbers<[1], [0], [0], [1], [0, 0, 1, 1], [], []>} : vector<16x32xf32>, vector<32x32xf32>, vector<16x32xf32> -> vector<16x32xf32>
    %c192 = arith.constant 192 : index
    %c0_3 = arith.constant 0 : index
    %3 = vector.load %arg2[%c192, %c0_3] : memref<320x32xf32, #tpu.memory_space<vmem>>, vector<16x32xf32>
    %4 = arith.addf %2, %3 : vector<16x32xf32>
    %c32 = arith.constant 32 : index
    %c0_4 = arith.constant 0 : index
    %5 = vector.load %arg2[%c32, %c0_4] : memref<320x32xf32, #tpu.memory_space<vmem>>, vector<32x32xf32>
    %cst_5 = arith.constant dense<0.000000e+00> : vector<16x32xf32>
    %6 = tpu.matmul %0, %5, %cst_5 {dimension_numbers = #tpu.dot_dimension_numbers<[1], [0], [0], [1], [0, 0, 1, 1], [], []>} : vector<16x32xf32>, vector<32x32xf32>, vector<16x32xf32> -> vector<16x32xf32>
    %c208 = arith.constant 208 : index
    %c0_6 = arith.constant 0 : index
    %7 = vector.load %arg2[%c208, %c0_6] : memref<320x32xf32, #tpu.memory_space<vmem>>, vector<16x32xf32>
    %8 = arith.addf %6, %7 : vector<16x32xf32>
    %c64 = arith.constant 64 : index
    %c0_7 = arith.constant 0 : index
    %9 = vector.load %arg2[%c64, %c0_7] : memref<320x32xf32, #tpu.memory_space<vmem>>, vector<32x32xf32>
    %cst_8 = arith.constant dense<0.000000e+00> : vector<16x32xf32>
    %10 = tpu.matmul %0, %9, %cst_8 {dimension_numbers = #tpu.dot_dimension_numbers<[1], [0], [0], [1], [0, 0, 1, 1], [], []>} : vector<16x32xf32>, vector<32x32xf32>, vector<16x32xf32> -> vector<16x32xf32>
    %c224 = arith.constant 224 : index
    %c0_9 = arith.constant 0 : index
    %11 = vector.load %arg2[%c224, %c0_9] : memref<320x32xf32, #tpu.memory_space<vmem>>, vector<16x32xf32>
    %12 = arith.addf %10, %11 : vector<16x32xf32>
    %13 = vector.shape_cast %4 : vector<16x32xf32> to vector<2x8x32xf32>
    %14 = vector.shape_cast %8 : vector<16x32xf32> to vector<2x8x32xf32>
    %15 = vector.shape_cast %12 : vector<16x32xf32> to vector<2x8x32xf32>
    %cst_10 = arith.constant 0.000000e+00 : f32
    %16 = vector.broadcast %cst_10 : f32 to vector<16x32xf32>
    %17 = vector.extract_strided_slice %13 {offsets = [0, 0, 0], sizes = [2, 8, 8], strides = [1, 1, 1]} : vector<2x8x32xf32> to vector<2x8x8xf32>
    %18 = vector.extract_strided_slice %14 {offsets = [0, 0, 0], sizes = [2, 8, 8], strides = [1, 1, 1]} : vector<2x8x32xf32> to vector<2x8x8xf32>
    "tpu.trace_start"() <{level = 10 : i32, message = "bld,bsd->bls"}> : () -> ()
    %cst_11 = arith.constant dense<0.000000e+00> : vector<2x8x8xf32>
    %19 = tpu.matmul %17, %18, %cst_11 {dimension_numbers = #tpu.dot_dimension_numbers<[2], [2], [1], [1], [0, 0, 0, 1, 1, 1], [0], [0]>} : vector<2x8x8xf32>, vector<2x8x8xf32>, vector<2x8x8xf32> -> vector<2x8x8xf32>
    "tpu.trace_stop"() : () -> ()
    %cst_12 = arith.constant 0.353553385 : f32
    %20 = vector.broadcast %cst_12 : f32 to vector<2x8x8xf32>
    %21 = arith.mulf %19, %20 : vector<2x8x8xf32>
    %cst_13 = arith.constant dense<0xFF800000> : vector<2x8xf32>
    %22 = vector.multi_reduction <maximumf>, %21, %cst_13 [2] : vector<2x8x8xf32> to vector<2x8xf32>
    %23 = vector.shape_cast %22 : vector<2x8xf32> to vector<2x8x1xf32>
    %24 = vector.broadcast %23 : vector<2x8x1xf32> to vector<2x8x8xf32>
    %25 = arith.subf %21, %24 : vector<2x8x8xf32>
    %26 = math.exp %25 : vector<2x8x8xf32>
    %cst_14 = arith.constant dense<0.000000e+00> : vector<2x8xf32>
    %27 = vector.multi_reduction <add>, %26, %cst_14 [2] : vector<2x8x8xf32> to vector<2x8xf32>
    %28 = vector.shape_cast %27 : vector<2x8xf32> to vector<2x8x1xf32>
    %29 = tpu.reciprocal %28 : vector<2x8x1xf32> -> vector<2x8x1xf32>
    %30 = vector.broadcast %29 : vector<2x8x1xf32> to vector<2x8x8xf32>
    %31 = arith.mulf %26, %30 : vector<2x8x8xf32>
    %32 = vector.extract_strided_slice %15 {offsets = [0, 0, 0], sizes = [2, 8, 8], strides = [1, 1, 1]} : vector<2x8x32xf32> to vector<2x8x8xf32>
    "tpu.trace_start"() <{level = 10 : i32, message = "bls,bsd->bld"}> : () -> ()
    %cst_15 = arith.constant dense<0.000000e+00> : vector<2x8x8xf32>
    %33 = tpu.matmul %31, %32, %cst_15 {dimension_numbers = #tpu.dot_dimension_numbers<[2], [1], [1], [2], [0, 0, 0, 1, 1, 2], [0], [0]>} : vector<2x8x8xf32>, vector<2x8x8xf32>, vector<2x8x8xf32> -> vector<2x8x8xf32>
    "tpu.trace_stop"() : () -> ()
    %34 = vector.shape_cast %33 : vector<2x8x8xf32> to vector<16x8xf32>
    %c96 = arith.constant 96 : index
    %c0_16 = arith.constant 0 : index
    %35 = vector.load %arg2[%c96, %c0_16] : memref<320x32xf32, #tpu.memory_space<vmem>>, vector<8x32xf32>
    %cst_17 = arith.constant dense<0.000000e+00> : vector<16x32xf32>
    %36 = tpu.matmul %34, %35, %cst_17 {dimension_numbers = #tpu.dot_dimension_numbers<[1], [0], [0], [1], [0, 0, 1, 1], [], []>} : vector<16x8xf32>, vector<8x32xf32>, vector<16x32xf32> -> vector<16x32xf32>
    %37 = arith.addf %16, %36 : vector<16x32xf32>
    %38 = vector.extract_strided_slice %13 {offsets = [0, 0, 8], sizes = [2, 8, 8], strides = [1, 1, 1]} : vector<2x8x32xf32> to vector<2x8x8xf32>
    %39 = vector.extract_strided_slice %14 {offsets = [0, 0, 8], sizes = [2, 8, 8], strides = [1, 1, 1]} : vector<2x8x32xf32> to vector<2x8x8xf32>
    "tpu.trace_start"() <{level = 10 : i32, message = "bld,bsd->bls"}> : () -> ()
    %cst_18 = arith.constant dense<0.000000e+00> : vector<2x8x8xf32>
    %40 = tpu.matmul %38, %39, %cst_18 {dimension_numbers = #tpu.dot_dimension_numbers<[2], [2], [1], [1], [0, 0, 0, 1, 1, 1], [0], [0]>} : vector<2x8x8xf32>, vector<2x8x8xf32>, vector<2x8x8xf32> -> vector<2x8x8xf32>
    "tpu.trace_stop"() : () -> ()
    %cst_19 = arith.constant 0.353553385 : f32
    %41 = vector.broadcast %cst_19 : f32 to vector<2x8x8xf32>
    %42 = arith.mulf %40, %41 : vector<2x8x8xf32>
    %cst_20 = arith.constant dense<0xFF800000> : vector<2x8xf32>
    %43 = vector.multi_reduction <maximumf>, %42, %cst_20 [2] : vector<2x8x8xf32> to vector<2x8xf32>
    %44 = vector.shape_cast %43 : vector<2x8xf32> to vector<2x8x1xf32>
    %45 = vector.broadcast %44 : vector<2x8x1xf32> to vector<2x8x8xf32>
    %46 = arith.subf %42, %45 : vector<2x8x8xf32>
    %47 = math.exp %46 : vector<2x8x8xf32>
    %cst_21 = arith.constant dense<0.000000e+00> : vector<2x8xf32>
    %48 = vector.multi_reduction <add>, %47, %cst_21 [2] : vector<2x8x8xf32> to vector<2x8xf32>
    %49 = vector.shape_cast %48 : vector<2x8xf32> to vector<2x8x1xf32>
    %50 = tpu.reciprocal %49 : vector<2x8x1xf32> -> vector<2x8x1xf32>
    %51 = vector.broadcast %50 : vector<2x8x1xf32> to vector<2x8x8xf32>
    %52 = arith.mulf %47, %51 : vector<2x8x8xf32>
    %53 = vector.extract_strided_slice %15 {offsets = [0, 0, 8], sizes = [2, 8, 8], strides = [1, 1, 1]} : vector<2x8x32xf32> to vector<2x8x8xf32>
    "tpu.trace_start"() <{level = 10 : i32, message = "bls,bsd->bld"}> : () -> ()
    %cst_22 = arith.constant dense<0.000000e+00> : vector<2x8x8xf32>
    %54 = tpu.matmul %52, %53, %cst_22 {dimension_numbers = #tpu.dot_dimension_numbers<[2], [1], [1], [2], [0, 0, 0, 1, 1, 2], [0], [0]>} : vector<2x8x8xf32>, vector<2x8x8xf32>, vector<2x8x8xf32> -> vector<2x8x8xf32>
    "tpu.trace_stop"() : () -> ()
    %55 = vector.shape_cast %54 : vector<2x8x8xf32> to vector<16x8xf32>
    %c104 = arith.constant 104 : index
    %c0_23 = arith.constant 0 : index
    %56 = vector.load %arg2[%c104, %c0_23] : memref<320x32xf32, #tpu.memory_space<vmem>>, vector<8x32xf32>
    %cst_24 = arith.constant dense<0.000000e+00> : vector<16x32xf32>
    %57 = tpu.matmul %55, %56, %cst_24 {dimension_numbers = #tpu.dot_dimension_numbers<[1], [0], [0], [1], [0, 0, 1, 1], [], []>} : vector<16x8xf32>, vector<8x32xf32>, vector<16x32xf32> -> vector<16x32xf32>
    %58 = arith.addf %37, %57 : vector<16x32xf32>
    %59 = vector.extract_strided_slice %13 {offsets = [0, 0, 16], sizes = [2, 8, 8], strides = [1, 1, 1]} : vector<2x8x32xf32> to vector<2x8x8xf32>
    %60 = vector.extract_strided_slice %14 {offsets = [0, 0, 16], sizes = [2, 8, 8], strides = [1, 1, 1]} : vector<2x8x32xf32> to vector<2x8x8xf32>
    "tpu.trace_start"() <{level = 10 : i32, message = "bld,bsd->bls"}> : () -> ()
    %cst_25 = arith.constant dense<0.000000e+00> : vector<2x8x8xf32>
    %61 = tpu.matmul %59, %60, %cst_25 {dimension_numbers = #tpu.dot_dimension_numbers<[2], [2], [1], [1], [0, 0, 0, 1, 1, 1], [0], [0]>} : vector<2x8x8xf32>, vector<2x8x8xf32>, vector<2x8x8xf32> -> vector<2x8x8xf32>
    "tpu.trace_stop"() : () -> ()
    %cst_26 = arith.constant 0.353553385 : f32
    %62 = vector.broadcast %cst_26 : f32 to vector<2x8x8xf32>
    %63 = arith.mulf %61, %62 : vector<2x8x8xf32>
    %cst_27 = arith.constant dense<0xFF800000> : vector<2x8xf32>
    %64 = vector.multi_reduction <maximumf>, %63, %cst_27 [2] : vector<2x8x8xf32> to vector<2x8xf32>
    %65 = vector.shape_cast %64 : vector<2x8xf32> to vector<2x8x1xf32>
    %66 = vector.broadcast %65 : vector<2x8x1xf32> to vector<2x8x8xf32>
    %67 = arith.subf %63, %66 : vector<2x8x8xf32>
    %68 = math.exp %67 : vector<2x8x8xf32>
    %cst_28 = arith.constant dense<0.000000e+00> : vector<2x8xf32>
    %69 = vector.multi_reduction <add>, %68, %cst_28 [2] : vector<2x8x8xf32> to vector<2x8xf32>
    %70 = vector.shape_cast %69 : vector<2x8xf32> to vector<2x8x1xf32>
    %71 = tpu.reciprocal %70 : vector<2x8x1xf32> -> vector<2x8x1xf32>
    %72 = vector.broadcast %71 : vector<2x8x1xf32> to vector<2x8x8xf32>
    %73 = arith.mulf %68, %72 : vector<2x8x8xf32>
    %74 = vector.extract_strided_slice %15 {offsets = [0, 0, 16], sizes = [2, 8, 8], strides = [1, 1, 1]} : vector<2x8x32xf32> to vector<2x8x8xf32>
    "tpu.trace_start"() <{level = 10 : i32, message = "bls,bsd->bld"}> : () -> ()
    %cst_29 = arith.constant dense<0.000000e+00> : vector<2x8x8xf32>
    %75 = tpu.matmul %73, %74, %cst_29 {dimension_numbers = #tpu.dot_dimension_numbers<[2], [1], [1], [2], [0, 0, 0, 1, 1, 2], [0], [0]>} : vector<2x8x8xf32>, vector<2x8x8xf32>, vector<2x8x8xf32> -> vector<2x8x8xf32>
    "tpu.trace_stop"() : () -> ()
    %76 = vector.shape_cast %75 : vector<2x8x8xf32> to vector<16x8xf32>
    %c112 = arith.constant 112 : index
    %c0_30 = arith.constant 0 : index
    %77 = vector.load %arg2[%c112, %c0_30] : memref<320x32xf32, #tpu.memory_space<vmem>>, vector<8x32xf32>
    %cst_31 = arith.constant dense<0.000000e+00> : vector<16x32xf32>
    %78 = tpu.matmul %76, %77, %cst_31 {dimension_numbers = #tpu.dot_dimension_numbers<[1], [0], [0], [1], [0, 0, 1, 1], [], []>} : vector<16x8xf32>, vector<8x32xf32>, vector<16x32xf32> -> vector<16x32xf32>
    %79 = arith.addf %58, %78 : vector<16x32xf32>
    %80 = vector.extract_strided_slice %13 {offsets = [0, 0, 24], sizes = [2, 8, 8], strides = [1, 1, 1]} : vector<2x8x32xf32> to vector<2x8x8xf32>
    %81 = vector.extract_strided_slice %14 {offsets = [0, 0, 24], sizes = [2, 8, 8], strides = [1, 1, 1]} : vector<2x8x32xf32> to vector<2x8x8xf32>
    "tpu.trace_start"() <{level = 10 : i32, message = "bld,bsd->bls"}> : () -> ()
    %cst_32 = arith.constant dense<0.000000e+00> : vector<2x8x8xf32>
    %82 = tpu.matmul %80, %81, %cst_32 {dimension_numbers = #tpu.dot_dimension_numbers<[2], [2], [1], [1], [0, 0, 0, 1, 1, 1], [0], [0]>} : vector<2x8x8xf32>, vector<2x8x8xf32>, vector<2x8x8xf32> -> vector<2x8x8xf32>
    "tpu.trace_stop"() : () -> ()
    %cst_33 = arith.constant 0.353553385 : f32
    %83 = vector.broadcast %cst_33 : f32 to vector<2x8x8xf32>
    %84 = arith.mulf %82, %83 : vector<2x8x8xf32>
    %cst_34 = arith.constant dense<0xFF800000> : vector<2x8xf32>
    %85 = vector.multi_reduction <maximumf>, %84, %cst_34 [2] : vector<2x8x8xf32> to vector<2x8xf32>
    %86 = vector.shape_cast %85 : vector<2x8xf32> to vector<2x8x1xf32>
    %87 = vector.broadcast %86 : vector<2x8x1xf32> to vector<2x8x8xf32>
    %88 = arith.subf %84, %87 : vector<2x8x8xf32>
    %89 = math.exp %88 : vector<2x8x8xf32>
    %cst_35 = arith.constant dense<0.000000e+00> : vector<2x8xf32>
    %90 = vector.multi_reduction <add>, %89, %cst_35 [2] : vector<2x8x8xf32> to vector<2x8xf32>
    %91 = vector.shape_cast %90 : vector<2x8xf32> to vector<2x8x1xf32>
    %92 = tpu.reciprocal %91 : vector<2x8x1xf32> -> vector<2x8x1xf32>
    %93 = vector.broadcast %92 : vector<2x8x1xf32> to vector<2x8x8xf32>
    %94 = arith.mulf %89, %93 : vector<2x8x8xf32>
    %95 = vector.extract_strided_slice %15 {offsets = [0, 0, 24], sizes = [2, 8, 8], strides = [1, 1, 1]} : vector<2x8x32xf32> to vector<2x8x8xf32>
    "tpu.trace_start"() <{level = 10 : i32, message = "bls,bsd->bld"}> : () -> ()
    %cst_36 = arith.constant dense<0.000000e+00> : vector<2x8x8xf32>
    %96 = tpu.matmul %94, %95, %cst_36 {dimension_numbers = #tpu.dot_dimension_numbers<[2], [1], [1], [2], [0, 0, 0, 1, 1, 2], [0], [0]>} : vector<2x8x8xf32>, vector<2x8x8xf32>, vector<2x8x8xf32> -> vector<2x8x8xf32>
    "tpu.trace_stop"() : () -> ()
    %97 = vector.shape_cast %96 : vector<2x8x8xf32> to vector<16x8xf32>
    %c120 = arith.constant 120 : index
    %c0_37 = arith.constant 0 : index
    %98 = vector.load %arg2[%c120, %c0_37] : memref<320x32xf32, #tpu.memory_space<vmem>>, vector<8x32xf32>
    %cst_38 = arith.constant dense<0.000000e+00> : vector<16x32xf32>
    %99 = tpu.matmul %97, %98, %cst_38 {dimension_numbers = #tpu.dot_dimension_numbers<[1], [0], [0], [1], [0, 0, 1, 1], [], []>} : vector<16x8xf32>, vector<8x32xf32>, vector<16x32xf32> -> vector<16x32xf32>
    %100 = arith.addf %79, %99 : vector<16x32xf32>
    %c240 = arith.constant 240 : index
    %c0_39 = arith.constant 0 : index
    %101 = vector.load %arg2[%c240, %c0_39] : memref<320x32xf32, #tpu.memory_space<vmem>>, vector<16x32xf32>
    %102 = arith.addf %100, %101 : vector<16x32xf32>
    %103 = arith.addf %0, %102 : vector<16x32xf32>
    %c256 = arith.constant 256 : index
    %c0_40 = arith.constant 0 : index
    %104 = vector.load %arg2[%c256, %c0_40] : memref<320x32xf32, #tpu.memory_space<vmem>>, vector<16x32xf32>
    %c272 = arith.constant 272 : index
    %c0_41 = arith.constant 0 : index
    %105 = vector.load %arg2[%c272, %c0_41] : memref<320x32xf32, #tpu.memory_space<vmem>>, vector<16x32xf32>
    %cst_42 = arith.constant dense<0.000000e+00> : vector<16xf32>
    %106 = vector.multi_reduction <add>, %103, %cst_42 [1] : vector<16x32xf32> to vector<16xf32>
    %107 = vector.shape_cast %106 : vector<16xf32> to vector<16x1xf32>
    %cst_43 = arith.constant 3.200000e+01 : f32
    %108 = vector.broadcast %cst_43 : f32 to vector<16x1xf32>
    %109 = arith.divf %107, %108 : vector<16x1xf32>
    %110 = vector.broadcast %109 : vector<16x1xf32> to vector<16x32xf32>
    %111 = arith.subf %103, %110 : vector<16x32xf32>
    %112 = arith.mulf %111, %111 : vector<16x32xf32>
    %cst_44 = arith.constant dense<0.000000e+00> : vector<16xf32>
    %113 = vector.multi_reduction <add>, %112, %cst_44 [1] : vector<16x32xf32> to vector<16xf32>
    %114 = vector.shape_cast %113 : vector<16xf32> to vector<16x1xf32>
    %cst_45 = arith.constant 3.200000e+01 : f32
    %115 = vector.broadcast %cst_45 : f32 to vector<16x1xf32>
    %116 = arith.divf %114, %115 : vector<16x1xf32>
    %117 = vector.broadcast %109 : vector<16x1xf32> to vector<16x32xf32>
    %118 = arith.subf %103, %117 : vector<16x32xf32>
    %cst_46 = arith.constant 9.99999974E-6 : f32
    %119 = vector.broadcast %cst_46 : f32 to vector<16x1xf32>
    %120 = arith.addf %116, %119 : vector<16x1xf32>
    %121 = math.rsqrt %120 : vector<16x1xf32>
    %122 = vector.broadcast %121 : vector<16x1xf32> to vector<16x32xf32>
    %123 = arith.mulf %118, %122 : vector<16x32xf32>
    %124 = arith.mulf %123, %104 : vector<16x32xf32>
    %125 = arith.addf %124, %105 : vector<16x32xf32>
    %c0_47 = arith.constant 0 : index
    %c0_48 = arith.constant 0 : index
    %126 = vector.load %arg4[%c0_47, %c0_48] : memref<32x128xf32, #tpu.memory_space<vmem>>, vector<32x128xf32>
    %cst_49 = arith.constant dense<0.000000e+00> : vector<16x128xf32>
    %127 = tpu.matmul %125, %126, %cst_49 {dimension_numbers = #tpu.dot_dimension_numbers<[1], [0], [0], [1], [0, 0, 1, 1], [], []>} : vector<16x32xf32>, vector<32x128xf32>, vector<16x128xf32> -> vector<16x128xf32>
    %128 = vector.extract_strided_slice %127 {offsets = [0, 0], sizes = [16, 64], strides = [1, 1]} : vector<16x128xf32> to vector<16x64xf32>
    %129 = vector.extract_strided_slice %127 {offsets = [0, 64], sizes = [16, 64], strides = [1, 1]} : vector<16x128xf32> to vector<16x64xf32>
    %cst_50 = arith.constant 0.000000e+00 : f32
    %130 = vector.broadcast %cst_50 : f32 to vector<3x64xf32>
    %131 = tpu.concatenate %130, %128 in 0 : vector<3x64xf32>, vector<16x64xf32> -> vector<19x64xf32>
    %132 = tpu.iota {dimensions = array<i32: 0>} : vector<16x1xi32>
    %c7_i32 = arith.constant 7 : i32
    %133 = vector.broadcast %c7_i32 : i32 to vector<16x1xi32>
    %134 = arith.andi %132, %133 : vector<16x1xi32>
    %c120_51 = arith.constant 120 : index
    %c0_52 = arith.constant 0 : index
    %135 = vector.load %arg3[%c120_51, %c0_52] : memref<184x64xf32, #tpu.memory_space<vmem>>, vector<16x64xf32>
    %136 = arith.mulf %128, %135 : vector<16x64xf32>
    %137 = vector.extract_strided_slice %131 {offsets = [0, 0], sizes = [16, 64], strides = [1, 1]} : vector<19x64xf32> to vector<16x64xf32>
    %c3_i32 = arith.constant 3 : i32
    %138 = vector.broadcast %c3_i32 : i32 to vector<16x1xi32>
    %139 = arith.cmpi sge, %134, %138 : vector<16x1xi32>
    %cst_53 = arith.constant 0.000000e+00 : f32
    %140 = vector.shape_cast %139 : vector<16x1xi1> to vector<16x1xi1>
    %141 = vector.broadcast %140 : vector<16x1xi1> to vector<16x64xi1>
    %142 = vector.broadcast %cst_53 : f32 to vector<16x64xf32>
    %143 = arith.select %141, %137, %142 : vector<16x64xi1>, vector<16x64xf32>
    %c72 = arith.constant 72 : index
    %c0_54 = arith.constant 0 : index
    %144 = vector.load %arg3[%c72, %c0_54] : memref<184x64xf32, #tpu.memory_space<vmem>>, vector<16x64xf32>
    %145 = arith.mulf %143, %144 : vector<16x64xf32>
    %146 = arith.addf %136, %145 : vector<16x64xf32>
    %147 = vector.extract_strided_slice %131 {offsets = [1, 0], sizes = [16, 64], strides = [1, 1]} : vector<19x64xf32> to vector<16x64xf32>
    %c2_i32 = arith.constant 2 : i32
    %148 = vector.broadcast %c2_i32 : i32 to vector<16x1xi32>
    %149 = arith.cmpi sge, %134, %148 : vector<16x1xi32>
    %cst_55 = arith.constant 0.000000e+00 : f32
    %150 = vector.shape_cast %149 : vector<16x1xi1> to vector<16x1xi1>
    %151 = vector.broadcast %150 : vector<16x1xi1> to vector<16x64xi1>
    %152 = vector.broadcast %cst_55 : f32 to vector<16x64xf32>
    %153 = arith.select %151, %147, %152 : vector<16x64xi1>, vector<16x64xf32>
    %c88 = arith.constant 88 : index
    %c0_56 = arith.constant 0 : index
    %154 = vector.load %arg3[%c88, %c0_56] : memref<184x64xf32, #tpu.memory_space<vmem>>, vector<16x64xf32>
    %155 = arith.mulf %153, %154 : vector<16x64xf32>
    %156 = arith.addf %146, %155 : vector<16x64xf32>
    %157 = vector.extract_strided_slice %131 {offsets = [2, 0], sizes = [16, 64], strides = [1, 1]} : vector<19x64xf32> to vector<16x64xf32>
    %c1_i32 = arith.constant 1 : i32
    %158 = vector.broadcast %c1_i32 : i32 to vector<16x1xi32>
    %159 = arith.cmpi sge, %134, %158 : vector<16x1xi32>
    %cst_57 = arith.constant 0.000000e+00 : f32
    %160 = vector.shape_cast %159 : vector<16x1xi1> to vector<16x1xi1>
    %161 = vector.broadcast %160 : vector<16x1xi1> to vector<16x64xi1>
    %162 = vector.broadcast %cst_57 : f32 to vector<16x64xf32>
    %163 = arith.select %161, %157, %162 : vector<16x64xi1>, vector<16x64xf32>
    %c104_58 = arith.constant 104 : index
    %c0_59 = arith.constant 0 : index
    %164 = vector.load %arg3[%c104_58, %c0_59] : memref<184x64xf32, #tpu.memory_space<vmem>>, vector<16x64xf32>
    %165 = arith.mulf %163, %164 : vector<16x64xf32>
    %166 = arith.addf %156, %165 : vector<16x64xf32>
    %c136 = arith.constant 136 : index
    %c0_60 = arith.constant 0 : index
    %167 = vector.load %arg3[%c136, %c0_60] : memref<184x64xf32, #tpu.memory_space<vmem>>, vector<16x64xf32>
    %168 = arith.addf %166, %167 : vector<16x64xf32>
    %169 = arith.negf %168 : vector<16x64xf32>
    %170 = math.exp %169 : vector<16x64xf32>
    %cst_61 = arith.constant 1.000000e+00 : f32
    %171 = vector.broadcast %cst_61 : f32 to vector<16x64xf32>
    %172 = arith.addf %171, %170 : vector<16x64xf32>
    %173 = arith.divf %171, %172 : vector<16x64xf32>
    %174 = arith.mulf %168, %173 : vector<16x64xf32>
    %c8 = arith.constant 8 : index
    %c0_62 = arith.constant 0 : index
    %175 = vector.load %arg3[%c8, %c0_62] : memref<184x64xf32, #tpu.memory_space<vmem>>, vector<64x64xf32>
    %cst_63 = arith.constant dense<0.000000e+00> : vector<16x64xf32>
    %176 = tpu.matmul %174, %175, %cst_63 {dimension_numbers = #tpu.dot_dimension_numbers<[1], [0], [0], [1], [0, 0, 1, 1], [], []>} : vector<16x64xf32>, vector<64x64xf32>, vector<16x64xf32> -> vector<16x64xf32>
    %c152 = arith.constant 152 : index
    %c0_64 = arith.constant 0 : index
    %177 = vector.load %arg3[%c152, %c0_64] : memref<184x64xf32, #tpu.memory_space<vmem>>, vector<16x64xf32>
    %178 = arith.addf %176, %177 : vector<16x64xf32>
    %cst_65 = arith.constant 0.000000e+00 : f32
    %179 = vector.broadcast %cst_65 : f32 to vector<16x64xf32>
    %180 = arith.maximumf %178, %179 : vector<16x64xf32>
    %181 = math.absf %178 : vector<16x64xf32>
    %cst_66 = arith.constant 0.000000e+00 : f32
    %182 = vector.broadcast %cst_66 : f32 to vector<16x64xf32>
    %183 = arith.subf %182, %181 : vector<16x64xf32>
    %184 = math.exp %183 : vector<16x64xf32>
    %185 = math.log1p %184 : vector<16x64xf32>
    %186 = arith.addf %180, %185 : vector<16x64xf32>
    %c0_67 = arith.constant 0 : index
    %c0_68 = arith.constant 0 : index
    %187 = vector.load %arg5[%c0_67, %c0_68] : memref<128x8xf32, #tpu.memory_space<vmem>>, vector<64x8xf32>
    %cst_69 = arith.constant dense<0.000000e+00> : vector<16x8xf32>
    %188 = tpu.matmul %174, %187, %cst_69 {dimension_numbers = #tpu.dot_dimension_numbers<[1], [0], [0], [1], [0, 0, 1, 1], [], []>} : vector<16x64xf32>, vector<64x8xf32>, vector<16x8xf32> -> vector<16x8xf32>
    %c64_70 = arith.constant 64 : index
    %c0_71 = arith.constant 0 : index
    %189 = vector.load %arg5[%c64_70, %c0_71] : memref<128x8xf32, #tpu.memory_space<vmem>>, vector<64x8xf32>
    %cst_72 = arith.constant dense<0.000000e+00> : vector<16x8xf32>
    %190 = tpu.matmul %174, %189, %cst_72 {dimension_numbers = #tpu.dot_dimension_numbers<[1], [0], [0], [1], [0, 0, 1, 1], [], []>} : vector<16x64xf32>, vector<64x8xf32>, vector<16x8xf32> -> vector<16x8xf32>
    %c0_73 = arith.constant 0 : index
    %c0_74 = arith.constant 0 : index
    %191 = vector.load %arg3[%c0_73, %c0_74] : memref<184x64xf32, #tpu.memory_space<vmem>>, vector<8x64xf32>
    %192 = math.exp %191 : vector<8x64xf32>
    %cst_75 = arith.constant 0.000000e+00 : f32
    %193 = vector.broadcast %cst_75 : f32 to vector<8x64xf32>
    %194 = arith.subf %193, %192 : vector<8x64xf32>
    %195 = arith.mulf %186, %174 : vector<16x64xf32>
    %196 = vector.extract_strided_slice %186 {offsets = [0, 0], sizes = [8, 64], strides = [1, 1]} : vector<16x64xf32> to vector<8x64xf32>
    %197 = vector.extract_strided_slice %186 {offsets = [8, 0], sizes = [8, 64], strides = [1, 1]} : vector<16x64xf32> to vector<8x64xf32>
    %198 = tpu.concatenate %196, %197 in 1 : vector<8x64xf32>, vector<8x64xf32> -> vector<8x128xf32>
    %199 = tpu.concatenate %194, %194 in 1 : vector<8x64xf32>, vector<8x64xf32> -> vector<8x128xf32>
    %200 = vector.shape_cast %198 : vector<8x128xf32> to vector<8x1x128xf32>
    %201 = vector.shape_cast %199 : vector<8x128xf32> to vector<1x8x128xf32>
    %202 = vector.broadcast %200 : vector<8x1x128xf32> to vector<8x8x128xf32>
    %203 = vector.broadcast %201 : vector<1x8x128xf32> to vector<8x8x128xf32>
    %204 = arith.mulf %202, %203 : vector<8x8x128xf32>
    %205 = math.exp %204 : vector<8x8x128xf32>
    %206 = vector.shape_cast %188 : vector<16x8xf32> to vector<16x8x1xf32>
    %207 = vector.shape_cast %195 : vector<16x64xf32> to vector<16x1x64xf32>
    %208 = vector.broadcast %206 : vector<16x8x1xf32> to vector<16x8x64xf32>
    %209 = vector.broadcast %207 : vector<16x1x64xf32> to vector<16x8x64xf32>
    %210 = arith.mulf %208, %209 : vector<16x8x64xf32>
    %211 = vector.extract_strided_slice %210 {offsets = [0, 0, 0], sizes = [8, 8, 64], strides = [1, 1, 1]} : vector<16x8x64xf32> to vector<8x8x64xf32>
    %212 = vector.extract_strided_slice %210 {offsets = [8, 0, 0], sizes = [8, 8, 64], strides = [1, 1, 1]} : vector<16x8x64xf32> to vector<8x8x64xf32>
    %213 = tpu.concatenate %211, %212 in 2 : vector<8x8x64xf32>, vector<8x8x64xf32> -> vector<8x8x128xf32>
    %cst_76 = arith.constant 0.000000e+00 : f32
    %214 = vector.broadcast %cst_76 : f32 to vector<8x128xf32>
    %215 = vector.extract_strided_slice %205 {offsets = [0, 0, 0], sizes = [1, 8, 128], strides = [1, 1, 1]} : vector<8x8x128xf32> to vector<1x8x128xf32>
    %216 = vector.shape_cast %215 : vector<1x8x128xf32> to vector<8x128xf32>
    %217 = arith.mulf %216, %214 : vector<8x128xf32>
    %218 = vector.extract_strided_slice %213 {offsets = [0, 0, 0], sizes = [1, 8, 128], strides = [1, 1, 1]} : vector<8x8x128xf32> to vector<1x8x128xf32>
    %219 = vector.shape_cast %218 : vector<1x8x128xf32> to vector<8x128xf32>
    %220 = arith.addf %217, %219 : vector<8x128xf32>
    %c0_77 = arith.constant 0 : index
    %c0_78 = arith.constant 0 : index
    %c0_79 = arith.constant 0 : index
    %221 = vector.load %arg7[%c0_77, %c0_78, %c0_79] : memref<8x8x128xf32, #tpu.memory_space<vmem>>, vector<1x8x128xf32>
    %222 = vector.shape_cast %221 : vector<1x8x128xf32> to vector<8x128xf32>
    %223 = vector.shape_cast %220 : vector<8x128xf32> to vector<1x8x128xf32>
    tpu.vector_store %arg7[%c0_77, %c0_78, %c0_79], %223 {strides = array<i32>} : memref<8x8x128xf32, #tpu.memory_space<vmem>>, vector<1x8x128xf32>,
    %224 = vector.extract_strided_slice %205 {offsets = [1, 0, 0], sizes = [1, 8, 128], strides = [1, 1, 1]} : vector<8x8x128xf32> to vector<1x8x128xf32>
    %225 = vector.shape_cast %224 : vector<1x8x128xf32> to vector<8x128xf32>
    %226 = arith.mulf %225, %220 : vector<8x128xf32>
    %227 = vector.extract_strided_slice %213 {offsets = [1, 0, 0], sizes = [1, 8, 128], strides = [1, 1, 1]} : vector<8x8x128xf32> to vector<1x8x128xf32>
    %228 = vector.shape_cast %227 : vector<1x8x128xf32> to vector<8x128xf32>
    %229 = arith.addf %226, %228 : vector<8x128xf32>
    %c1 = arith.constant 1 : index
    %c0_80 = arith.constant 0 : index
    %c0_81 = arith.constant 0 : index
    %230 = vector.load %arg7[%c1, %c0_80, %c0_81] : memref<8x8x128xf32, #tpu.memory_space<vmem>>, vector<1x8x128xf32>
    %231 = vector.shape_cast %230 : vector<1x8x128xf32> to vector<8x128xf32>
    %232 = vector.shape_cast %229 : vector<8x128xf32> to vector<1x8x128xf32>
    tpu.vector_store %arg7[%c1, %c0_80, %c0_81], %232 {strides = array<i32>} : memref<8x8x128xf32, #tpu.memory_space<vmem>>, vector<1x8x128xf32>,
    %233 = vector.extract_strided_slice %205 {offsets = [2, 0, 0], sizes = [1, 8, 128], strides = [1, 1, 1]} : vector<8x8x128xf32> to vector<1x8x128xf32>
    %234 = vector.shape_cast %233 : vector<1x8x128xf32> to vector<8x128xf32>
    %235 = arith.mulf %234, %229 : vector<8x128xf32>
    %236 = vector.extract_strided_slice %213 {offsets = [2, 0, 0], sizes = [1, 8, 128], strides = [1, 1, 1]} : vector<8x8x128xf32> to vector<1x8x128xf32>
    %237 = vector.shape_cast %236 : vector<1x8x128xf32> to vector<8x128xf32>
    %238 = arith.addf %235, %237 : vector<8x128xf32>
    %c2 = arith.constant 2 : index
    %c0_82 = arith.constant 0 : index
    %c0_83 = arith.constant 0 : index
    %239 = vector.load %arg7[%c2, %c0_82, %c0_83] : memref<8x8x128xf32, #tpu.memory_space<vmem>>, vector<1x8x128xf32>
    %240 = vector.shape_cast %239 : vector<1x8x128xf32> to vector<8x128xf32>
    %241 = vector.shape_cast %238 : vector<8x128xf32> to vector<1x8x128xf32>
    tpu.vector_store %arg7[%c2, %c0_82, %c0_83], %241 {strides = array<i32>} : memref<8x8x128xf32, #tpu.memory_space<vmem>>, vector<1x8x128xf32>,
    %242 = vector.extract_strided_slice %205 {offsets = [3, 0, 0], sizes = [1, 8, 128], strides = [1, 1, 1]} : vector<8x8x128xf32> to vector<1x8x128xf32>
    %243 = vector.shape_cast %242 : vector<1x8x128xf32> to vector<8x128xf32>
    %244 = arith.mulf %243, %238 : vector<8x128xf32>
    %245 = vector.extract_strided_slice %213 {offsets = [3, 0, 0], sizes = [1, 8, 128], strides = [1, 1, 1]} : vector<8x8x128xf32> to vector<1x8x128xf32>
    %246 = vector.shape_cast %245 : vector<1x8x128xf32> to vector<8x128xf32>
    %247 = arith.addf %244, %246 : vector<8x128xf32>
    %c3 = arith.constant 3 : index
    %c0_84 = arith.constant 0 : index
    %c0_85 = arith.constant 0 : index
    %248 = vector.load %arg7[%c3, %c0_84, %c0_85] : memref<8x8x128xf32, #tpu.memory_space<vmem>>, vector<1x8x128xf32>
    %249 = vector.shape_cast %248 : vector<1x8x128xf32> to vector<8x128xf32>
    %250 = vector.shape_cast %247 : vector<8x128xf32> to vector<1x8x128xf32>
    tpu.vector_store %arg7[%c3, %c0_84, %c0_85], %250 {strides = array<i32>} : memref<8x8x128xf32, #tpu.memory_space<vmem>>, vector<1x8x128xf32>,
    %251 = vector.extract_strided_slice %205 {offsets = [4, 0, 0], sizes = [1, 8, 128], strides = [1, 1, 1]} : vector<8x8x128xf32> to vector<1x8x128xf32>
    %252 = vector.shape_cast %251 : vector<1x8x128xf32> to vector<8x128xf32>
    %253 = arith.mulf %252, %247 : vector<8x128xf32>
    %254 = vector.extract_strided_slice %213 {offsets = [4, 0, 0], sizes = [1, 8, 128], strides = [1, 1, 1]} : vector<8x8x128xf32> to vector<1x8x128xf32>
    %255 = vector.shape_cast %254 : vector<1x8x128xf32> to vector<8x128xf32>
    %256 = arith.addf %253, %255 : vector<8x128xf32>
    %c4 = arith.constant 4 : index
    %c0_86 = arith.constant 0 : index
    %c0_87 = arith.constant 0 : index
    %257 = vector.load %arg7[%c4, %c0_86, %c0_87] : memref<8x8x128xf32, #tpu.memory_space<vmem>>, vector<1x8x128xf32>
    %258 = vector.shape_cast %257 : vector<1x8x128xf32> to vector<8x128xf32>
    %259 = vector.shape_cast %256 : vector<8x128xf32> to vector<1x8x128xf32>
    tpu.vector_store %arg7[%c4, %c0_86, %c0_87], %259 {strides = array<i32>} : memref<8x8x128xf32, #tpu.memory_space<vmem>>, vector<1x8x128xf32>,
    %260 = vector.extract_strided_slice %205 {offsets = [5, 0, 0], sizes = [1, 8, 128], strides = [1, 1, 1]} : vector<8x8x128xf32> to vector<1x8x128xf32>
    %261 = vector.shape_cast %260 : vector<1x8x128xf32> to vector<8x128xf32>
    %262 = arith.mulf %261, %256 : vector<8x128xf32>
    %263 = vector.extract_strided_slice %213 {offsets = [5, 0, 0], sizes = [1, 8, 128], strides = [1, 1, 1]} : vector<8x8x128xf32> to vector<1x8x128xf32>
    %264 = vector.shape_cast %263 : vector<1x8x128xf32> to vector<8x128xf32>
    %265 = arith.addf %262, %264 : vector<8x128xf32>
    %c5 = arith.constant 5 : index
    %c0_88 = arith.constant 0 : index
    %c0_89 = arith.constant 0 : index
    %266 = vector.load %arg7[%c5, %c0_88, %c0_89] : memref<8x8x128xf32, #tpu.memory_space<vmem>>, vector<1x8x128xf32>
    %267 = vector.shape_cast %266 : vector<1x8x128xf32> to vector<8x128xf32>
    %268 = vector.shape_cast %265 : vector<8x128xf32> to vector<1x8x128xf32>
    tpu.vector_store %arg7[%c5, %c0_88, %c0_89], %268 {strides = array<i32>} : memref<8x8x128xf32, #tpu.memory_space<vmem>>, vector<1x8x128xf32>,
    %269 = vector.extract_strided_slice %205 {offsets = [6, 0, 0], sizes = [1, 8, 128], strides = [1, 1, 1]} : vector<8x8x128xf32> to vector<1x8x128xf32>
    %270 = vector.shape_cast %269 : vector<1x8x128xf32> to vector<8x128xf32>
    %271 = arith.mulf %270, %265 : vector<8x128xf32>
    %272 = vector.extract_strided_slice %213 {offsets = [6, 0, 0], sizes = [1, 8, 128], strides = [1, 1, 1]} : vector<8x8x128xf32> to vector<1x8x128xf32>
    %273 = vector.shape_cast %272 : vector<1x8x128xf32> to vector<8x128xf32>
    %274 = arith.addf %271, %273 : vector<8x128xf32>
    %c6 = arith.constant 6 : index
    %c0_90 = arith.constant 0 : index
    %c0_91 = arith.constant 0 : index
    %275 = vector.load %arg7[%c6, %c0_90, %c0_91] : memref<8x8x128xf32, #tpu.memory_space<vmem>>, vector<1x8x128xf32>
    %276 = vector.shape_cast %275 : vector<1x8x128xf32> to vector<8x128xf32>
    %277 = vector.shape_cast %274 : vector<8x128xf32> to vector<1x8x128xf32>
    tpu.vector_store %arg7[%c6, %c0_90, %c0_91], %277 {strides = array<i32>} : memref<8x8x128xf32, #tpu.memory_space<vmem>>, vector<1x8x128xf32>,
    %278 = vector.extract_strided_slice %205 {offsets = [7, 0, 0], sizes = [1, 8, 128], strides = [1, 1, 1]} : vector<8x8x128xf32> to vector<1x8x128xf32>
    %279 = vector.shape_cast %278 : vector<1x8x128xf32> to vector<8x128xf32>
    %280 = arith.mulf %279, %274 : vector<8x128xf32>
    %281 = vector.extract_strided_slice %213 {offsets = [7, 0, 0], sizes = [1, 8, 128], strides = [1, 1, 1]} : vector<8x8x128xf32> to vector<1x8x128xf32>
    %282 = vector.shape_cast %281 : vector<1x8x128xf32> to vector<8x128xf32>
    %283 = arith.addf %280, %282 : vector<8x128xf32>
    %c7 = arith.constant 7 : index
    %c0_92 = arith.constant 0 : index
    %c0_93 = arith.constant 0 : index
    %284 = vector.load %arg7[%c7, %c0_92, %c0_93] : memref<8x8x128xf32, #tpu.memory_space<vmem>>, vector<1x8x128xf32>
    %285 = vector.shape_cast %284 : vector<1x8x128xf32> to vector<8x128xf32>
    %286 = vector.shape_cast %283 : vector<8x128xf32> to vector<1x8x128xf32>
    tpu.vector_store %arg7[%c7, %c0_92, %c0_93], %286 {strides = array<i32>} : memref<8x8x128xf32, #tpu.memory_space<vmem>>, vector<1x8x128xf32>,
    %c0_94 = arith.constant 0 : index
    %c0_95 = arith.constant 0 : index
    %c0_96 = arith.constant 0 : index
    %287 = vector.load %arg7[%c0_94, %c0_95, %c0_96] : memref<8x8x128xf32, #tpu.memory_space<vmem>>, vector<8x8x128xf32>
    %288 = vector.extract_strided_slice %287 {offsets = [0, 0, 0], sizes = [8, 8, 64], strides = [1, 1, 1]} : vector<8x8x128xf32> to vector<8x8x64xf32>
    %289 = vector.extract_strided_slice %287 {offsets = [0, 0, 64], sizes = [8, 8, 64], strides = [1, 1, 1]} : vector<8x8x128xf32> to vector<8x8x64xf32>
    %290 = tpu.concatenate %288, %289 in 0 : vector<8x8x64xf32>, vector<8x8x64xf32> -> vector<16x8x64xf32>
    %291 = vector.shape_cast %190 : vector<16x8xf32> to vector<16x8x1xf32>
    %292 = vector.broadcast %291 : vector<16x8x1xf32> to vector<16x8x64xf32>
    %293 = arith.mulf %292, %290 : vector<16x8x64xf32>
    %cst_97 = arith.constant dense<0.000000e+00> : vector<16x64xf32>
    %294 = vector.multi_reduction <add>, %293, %cst_97 [1] : vector<16x8x64xf32> to vector<16x64xf32>
    %c168 = arith.constant 168 : index
    %c0_98 = arith.constant 0 : index
    %295 = vector.load %arg3[%c168, %c0_98] : memref<184x64xf32, #tpu.memory_space<vmem>>, vector<16x64xf32>
    %296 = arith.mulf %295, %174 : vector<16x64xf32>
    %297 = arith.addf %294, %296 : vector<16x64xf32>
    %298 = arith.negf %129 : vector<16x64xf32>
    %299 = math.exp %298 : vector<16x64xf32>
    %cst_99 = arith.constant 1.000000e+00 : f32
    %300 = vector.broadcast %cst_99 : f32 to vector<16x64xf32>
    %301 = arith.addf %300, %299 : vector<16x64xf32>
    %302 = arith.divf %300, %301 : vector<16x64xf32>
    %303 = arith.mulf %129, %302 : vector<16x64xf32>
    %304 = arith.mulf %297, %303 : vector<16x64xf32>
    %c128 = arith.constant 128 : index
    %c0_100 = arith.constant 0 : index
    %305 = vector.load %arg2[%c128, %c0_100] : memref<320x32xf32, #tpu.memory_space<vmem>>, vector<64x32xf32>
    %cst_101 = arith.constant dense<0.000000e+00> : vector<16x32xf32>
    %306 = tpu.matmul %304, %305, %cst_101 {dimension_numbers = #tpu.dot_dimension_numbers<[1], [0], [0], [1], [0, 0, 1, 1], [], []>} : vector<16x64xf32>, vector<64x32xf32>, vector<16x32xf32> -> vector<16x32xf32>
    %307 = arith.addf %125, %306 : vector<16x32xf32>
    %c288 = arith.constant 288 : index
    %c0_102 = arith.constant 0 : index
    %308 = vector.load %arg2[%c288, %c0_102] : memref<320x32xf32, #tpu.memory_space<vmem>>, vector<16x32xf32>
    %c304 = arith.constant 304 : index
    %c0_103 = arith.constant 0 : index
    %309 = vector.load %arg2[%c304, %c0_103] : memref<320x32xf32, #tpu.memory_space<vmem>>, vector<16x32xf32>
    %cst_104 = arith.constant dense<0.000000e+00> : vector<16xf32>
    %310 = vector.multi_reduction <add>, %307, %cst_104 [1] : vector<16x32xf32> to vector<16xf32>
    %311 = vector.shape_cast %310 : vector<16xf32> to vector<16x1xf32>
    %cst_105 = arith.constant 3.200000e+01 : f32
    %312 = vector.broadcast %cst_105 : f32 to vector<16x1xf32>
    %313 = arith.divf %311, %312 : vector<16x1xf32>
    %314 = vector.broadcast %313 : vector<16x1xf32> to vector<16x32xf32>
    %315 = arith.subf %307, %314 : vector<16x32xf32>
    %316 = arith.mulf %315, %315 : vector<16x32xf32>
    %cst_106 = arith.constant dense<0.000000e+00> : vector<16xf32>
    %317 = vector.multi_reduction <add>, %316, %cst_106 [1] : vector<16x32xf32> to vector<16xf32>
    %318 = vector.shape_cast %317 : vector<16xf32> to vector<16x1xf32>
    %cst_107 = arith.constant 3.200000e+01 : f32
    %319 = vector.broadcast %cst_107 : f32 to vector<16x1xf32>
    %320 = arith.divf %318, %319 : vector<16x1xf32>
    %321 = vector.broadcast %313 : vector<16x1xf32> to vector<16x32xf32>
    %322 = arith.subf %307, %321 : vector<16x32xf32>
    %cst_108 = arith.constant 9.99999974E-6 : f32
    %323 = vector.broadcast %cst_108 : f32 to vector<16x1xf32>
    %324 = arith.addf %320, %323 : vector<16x1xf32>
    %325 = math.rsqrt %324 : vector<16x1xf32>
    %326 = vector.broadcast %325 : vector<16x1xf32> to vector<16x32xf32>
    %327 = arith.mulf %322, %326 : vector<16x32xf32>
    %328 = arith.mulf %327, %308 : vector<16x32xf32>
    %329 = arith.addf %328, %309 : vector<16x32xf32>
    %c0_109 = arith.constant 0 : index
    %c0_110 = arith.constant 0 : index
    %330 = vector.load %arg6[%c0_109, %c0_110] : memref<16x32xf32, #tpu.memory_space<vmem>>, vector<16x32xf32>
    tpu.vector_store %arg6[%c0_109, %c0_110], %329 {strides = array<i32>} : memref<16x32xf32, #tpu.memory_space<vmem>>, vector<16x32xf32>,
    return
  }
  func.func @transform_0(%arg0: i32) -> (i32, i32) {
    %c0_i32 = arith.constant 0 : i32
    %c0_i32_0 = arith.constant 0 : i32
    %c0_i32_1 = arith.constant 0 : i32
    return %c0_i32, %c0_i32_0 : i32, i32
  }
  func.func @transform_1(%arg0: i32) -> (i32, i32) {
    %c0_i32 = arith.constant 0 : i32
    %c0_i32_0 = arith.constant 0 : i32
    %c0_i32_1 = arith.constant 0 : i32
    return %c0_i32, %c0_i32_0 : i32, i32
  }
  func.func @transform_2(%arg0: i32) -> (i32, i32) {
    %c0_i32 = arith.constant 0 : i32
    %c0_i32_0 = arith.constant 0 : i32
    %c0_i32_1 = arith.constant 0 : i32
    return %c0_i32, %c0_i32_0 : i32, i32
  }
  func.func @transform_3(%arg0: i32) -> (i32, i32) {
    %c0_i32 = arith.constant 0 : i32
    %c0_i32_0 = arith.constant 0 : i32
    %c0_i32_1 = arith.constant 0 : i32
    return %c0_i32, %c0_i32_0 : i32, i32
  }
  func.func @transform_4(%arg0: i32) -> (i32, i32) {
    %c0_i32 = arith.constant 0 : i32
    %c0_i32_0 = arith.constant 0 : i32
    %c0_i32_1 = arith.constant 0 : i32
    return %c0_i32, %c0_i32_0 : i32, i32
  }
  func.func @transform_5(%arg0: i32) -> (i32, i32) {
    %c0_i32 = arith.constant 0 : i32
    %c0_i32_0 = arith.constant 0 : i32
    %c0_i32_1 = arith.constant 0 : i32
    return %c0_i32, %c0_i32_0 : i32, i32
  }
}

</mosaic_0001>

<bundles_post_ra>
// kernel: tpu_custom_call.1
= control target key start
LH: loop header
LB: loop body
LE: loop exit
PB: predicated region body
PF: predicated region fallthrough
CT: control target
= control target key end

     0   :  { %vm29_vm0 = vcmask 261120   ;;  %s5090_s0 = inlined_call_operand.vmem [shape: f32[16,32], index: 0, kind: input, shape index: {}]   ;;  %s5091_s1 = inlined_call_operand.vmem [shape: f32[320,32], index: 1, kind: input, shape index: {}]   ;;  %s5092_s2 = inlined_call_operand.vmem [shape: f32[184,64], index: 2, kind: input, shape index: {}]   ;;  %s5093_s3 = inlined_call_operand.vmem [shape: f32[32,128], index: 3, kind: input, shape index: {}]   ;;  %s5094_s4 = inlined_call_operand.vmem [shape: f32[128,8], index: 4, kind: input, shape index: {}]   ;;  %s5095_s5 = inlined_call_operand.hbm [shape: f32[16,32], index: 5, kind: output, shape index: {}]  }
   0x1   :  { %v111_v0 = vld [vmem:[%s5091_s1 + $0x20] sm:$0xff]  ;;  %v112_v1 = vld [vmem:[%s5091_s1 + $0x28] sm:$0xff]  ;;  %v113_v5 = vld [vmem:[%s5091_s1 + $0x30] sm:$0xff] }
   0x2   :  { %v23_v2 = vld [vmem:[%s5091_s1] sm:$0xff]  ;;  %v3950_v3 = vpack.c.bf16 %v112_v1, %v111_v0  ;;  %v24_v4 = vld [vmem:[%s5091_s1 + $0x8] sm:$0xff]  ;;  %v114_v6 = vld [vmem:[%s5091_s1 + $0x38] sm:$0xff] }
   0x3   :  { %v3942_v7 = vpack.c.bf16 %v24_v4, %v23_v2  ;;  %v3954_v8 = vpack.c.bf16 %v114_v6, %v113_v5  ;;  %v25_v9 = vld [vmem:[%s5091_s1 + $0x10] sm:$0xff]  ;;  %v26_v10 = vld [vmem:[%s5091_s1 + $0x18] sm:$0xff]  ;;  %v4227_v11 = vld [vmem:[%s5090_s0] sm:$0xff] }
   0x4   :  { %3951 = vmatprep.subr.bf16.mxu1 %v3950_v3  ;;  %v3946_v12 = vpack.c.bf16 %v26_v10, %v25_v9  ;;  %3741 = vmatprep.mubr.msk.f32.mxu1 %vm29_vm0, %v4227_v11 }
   0x5   :  { %10 = vsyncpa [#allocation4], 0  ;;  %3953 = vmatpush3.bf16.msra.mxu1 %v3950_v3  ;;  %3943 = vmatprep.subr.bf16.mxu0 %v3942_v7  ;;  %v4236_v13 = vld [vmem:[%s5090_s0 + $0x8] sm:$0xff]  ;;  %v4160_v14 = vmov 0.0   ;;  %vm4161_vm1 = vmmov 0   ;;  %v116_v15 = vld [vmem:[%s5091_s1 + $0xd8] sm:$0xff] }
   0x6   :  { %3945 = vmatpush3.bf16.msra.mxu0 %v3942_v7  ;;  %3955 = vmatprep.subr.bf16.mxu1 %v3954_v8  ;;  %v115_v16 = vld [vmem:[%s5091_s1 + $0xd0] sm:$0xff]  ;;  %v28_v18 = vld [vmem:[%s5091_s1 + $0xc8] sm:$0xff]  ;;  %v27_v19 = vld [vmem:[%s5091_s1 + $0xc0] sm:$0xff]  ;;  %vm273_vm2 = vcmask 64512   ;;  %s4162_s20 = smov 120   ;;  %s4163_s8 = smov 112  }
   0x7   :  { %3947 = vmatprep.subr.bf16.mxu0 %v3946_v12  ;;  %3730 = vmatprep.mubr.msk.f32.mxu0 %vm29_vm0, %v4227_v11  ;;  %v192_v27 = vld [vmem:[%s5091_s1 + $0x40] sm:$0xff]  ;;  %v193_v28 = vld [vmem:[%s5091_s1 + $0x48] sm:$0xff]  ;;  %v194_v29 = vld [vmem:[%s5091_s1 + $0x50] sm:$0xff]  ;;  %s4164_s13 = smov 104   ;;  %vm2054_vm3 = vcmask 1042432   ;;  %vm2091_vm6 = vcmask 1046528  }
   0x8   :  { %v3958_v30 = vpack.c.bf16 %v193_v28, %v192_v27  ;;  %v195_v31 = vld [vmem:[%s5091_s1 + $0x58] sm:$0xff]  ;;  %v197_v46 = vld [vmem:[%s5091_s1 + $0xe8] sm:$0xff]  ;;  %v196_v50 = vld [vmem:[%s5091_s1 + $0xe0] sm:$0xff]  ;;  %vm2113_vm7 = vcmask 1045504   ;;  %vm2157_vm12 = vcmask 523264   ;;  %s4165_s27 = smov 64  }
   0x9   :  { %3957 = vmatpush3.bf16.msra.mxu1 %v3954_v8  ;;  %v3962_v32 = vpack.c.bf16 %v195_v31, %v194_v29  ;;  %vm3395_vm15 = vcmask 1041409   ;;  %s4167_s29 = smov [#allocation3]  }
   0xa   :  { %3949 = vmatpush3.bf16.msra.mxu0 %v3946_v12  ;;  %3755 = vmatprep.subr.mxu1 %v4160_v14  ;;  %s3551_s30 = sshll.u32 %s4167_s29, 4  ;;  %s3552_s30 = int_to_ptr.vmem [resolvable:$true] %s3551_s30 }
   0xb   :  { %3959 = vmatprep.subr.bf16.mxu0 %v3958_v30  ;;  %s4136_s6 = scalar_lea.vmem %s3552_s30, 256  ;;  %p4141_p1 = scmp.lt.s32.totalorder %s3552_s30, %s3552_s30 }
   0xc   :  { %3742 = vmatmul.mubr.msk.f32.vlgmr.msra.gmra.mrb[0].mxu1 %vm29_vm0, %v4236_v13  ;;  %p4137_p0 = scmp.ne.s32.totalorder %s3552_s30, %s4136_s6  ;;  %p4142_p2 = scmp.lt.s32.totalorder %s4136_s6, %s4136_s6 }
   0xd   :  { %3731 = vmatmul.mubr.msk.f32.vlgmr.msra.gmra.mrb[0].mxu0 %vm29_vm0, %v4236_v13  ;;  %3757 = vmatprep.mubr.msk.f32.mxu1 %vm4161_vm1, %v4160_v14 }
   0xe   :  { %3752 = vmatprep.mubr.msk.f32.mxu0 %vm29_vm0, %v4227_v11  ;;  %3961 = vmatpush3.bf16.msra.mxu0 %v3958_v30  ;;  %p4143_p3 = por %p4142_p2, %p4141_p1 }
   0xf   :  { %3963 = vmatprep.subr.bf16.mxu0 %v3962_v32 }
  0x10   :  { %p4144_p4 = pnand %p4143_p3, %p4137_p0 }
  0x12   :  { %3965 = vmatpush3.bf16.msra.mxu0 %v3962_v32 }
  0x13   :  { %3765 = vmatprep.subr.mxu0 %v4160_v14 }
  0x15   :  { %3753 = vmatmul.mubr.msk.f32.vlgmr.msra.gmra.mrb[2].mxu0 %vm29_vm0, %v4236_v13 }
  0x16   :  { %3767 = vmatprep.mubr.msk.f32.mxu0 %vm4161_vm1, %v4160_v14 }
  0xdf   :  { %v3743_v17 = vpop.f32.mrb[0].mxu1 }
  0xe0   :  { %v4259_v20 = vadd.f32 %v3743_v17, %v116_v15  ;;  %v183_v21 = vpop.f32.mrb[1].mxu1  ;;  %v3732_v22 = vpop.f32.mrb[0].mxu0 }
  0xe1   :  { %v4261_v23 = vadd.f32 %v183_v21, %v115_v16  ;;  %v102_v24 = vpop.f32.mrb[1].mxu0  ;;  %v4265_v25 = vadd.f32 %v3732_v22, %v28_v18 }
  0xe2   :  { %677 = vrot.lane.b32.xlu1 %v4259_v20, %s4162_s20  ;;  %v4267_v26 = vadd.f32 %v102_v24, %v27_v19 }
  0xe3   :  { %3756 = vmatpush3.xpose.msk.msra.mxu1 %vm273_vm2, %v4261_v23 }
  0xe4   :  { %3760 = vmatprep.subr.mxu1 %v4160_v14 }
  0xe6   :  { %675 = vrot.lane.b32.xlu1 %v4265_v25, %s4162_s20  ;;  %3758 = vmatmul.mubr.msk.f32.vlgmr.msra.gmra.mrb[2].mxu1 %vm273_vm2, %v4267_v26 }
  0xe7   :  { %3761 = vmatpush3.xpose.msk.msra.mxu1 %vm273_vm2, %v4259_v20  ;;  %3762 = vmatprep.mubr.msk.f32.mxu1 %vm4161_vm1, %v4160_v14 }
  0xe8   :  { %3770 = vmatprep.subr.mxu1 %v4160_v14  ;;  %v3754_v47 = vpop.f32.mrb[2].mxu0 }
  0xe9   :  { %v4308_v48 = vadd.f32 %v3754_v47, %v197_v46  ;;  %v264_v49 = vpop.f32.mrb[3].mxu0 }
  0xea   :  { %3763 = vmatmul.mubr.msk.f32.vlgmr.msra.gmra.mrb[4].mxu1 %vm273_vm2, %v4265_v25  ;;  %v4315_v51 = vadd.f32 %v264_v49, %v196_v50 }
  0xeb   :  { %3772 = vmatprep.mubr.msk.f32.mxu1 %vm4161_vm1, %v4160_v14  ;;  %3771 = vmatpush3.msra.mxu1 %v4308_v48 }
  0xec   :  { %3780 = vmatprep.subr.mxu1 %v4160_v14  ;;  %3766 = vmatpush3.msra.mxu0 %v4315_v51 }
  0xed   :  { %3775 = vmatprep.subr.mxu0 %v4160_v14 }
 0x154   :  { %v678_v57 = vpop.permute.xlu1 %677 }
 0x158   :  { %v676_v59 = vpop.permute.xlu1 %675 }
 0x1b9   :  { %v346_v33 = vpop.f32.mrb[2].mxu1 }
 0x1ba   :  { %v3759_v34 = vpop.f32.mrb[3].mxu1  ;;  %v426_v43 = vmul.f32 0.35355338, %v346_v33 }
 0x1bc   :  { %v428_v45 = vsel %vm273_vm2, %v426_v43, -inf }
 0x1bd   :  { %v422_v35 = vpop.f32.mrb[4].mxu1 }
 0x1be   :  { %v427_v36 = vmul.f32 0.35355338, %v422_v35  ;;  %v3764_v37 = vpop.f32.mrb[5].mxu1 }
 0x1c0   :  { %v431_v38 = vsel %vm273_vm2, %v427_v36, -inf }
 0x1c1   :  { %432 = vmax.xlane.f32.xlu0 %v431_v38 }
 0x24e   :  { %v433_v39 = vpop.xlane.xlu0 %432 }
 0x24f   :  { %v435_v40 = vsub.f32 %v427_v36, %v433_v39 }
 0x251   :  { %v438_v41 = vmul.f32 1.442695, %v435_v40 }
 0x253   :  { %4054 = vpow2.f32 %v438_v41 }
 0x25d   :  { %v4055_v42 = vpop.eup %4054 }
 0x25e   :  { %v443_v44 = vsel %vm273_vm2, %v4055_v42, 0.0 }
 0x25f   :  { %444 = vadd.xlane.f32.xlu0 %v443_v44 }
 0x263   :  { %429 = vmax.xlane.f32.xlu0 %v428_v45 }
 0x279   :  { %599 = vrot.lane.b32.xlu0 %v4261_v23, %s4162_s20 }
 0x27d   :  { %597 = vrot.lane.b32.xlu0 %v4267_v26, %s4162_s20 }
 0x2ec   :  { %v445_v52 = vpop.xlane.xlu0 %444 }
 0x2ed   :  { %4056 = vrcp.f32 %v445_v52 }
 0x2f0   :  { %v430_v53 = vpop.xlane.xlu0 %429 }
 0x2f1   :  { %v434_v54 = vsub.f32 %v426_v43, %v430_v53 }
 0x2f3   :  { %v436_v55 = vmul.f32 1.442695, %v434_v54 }
 0x2f4   :  { %v600_v1 = vpop.permute.xlu0 %599 }
 0x2f5   :  { %4058 = vpow2.f32 %v436_v55 }
 0x2f7   :  { %v4057_v56 = vpop.eup %4056 }
 0x2f8   :  { %v449_v58 = vmul.f32 %v4057_v56, %v4055_v42  ;;  %v598_v3 = vpop.permute.xlu0 %597  ;;  %v931_v56 = vld [vmem:[%s5091_s1 + $0x68] sm:$0xff] }
 0x2fa   :  { %3773 = vmatmul.mubr.msk.f32.vlgmr.msra.gmra.mrb[6].mxu1 %vm273_vm2, %v449_v58 }
 0x2fb   :  { %3781 = vmatpush3.xpose.msk.msra.mxu1 %vm273_vm2, %v678_v57  ;;  %3782 = vmatprep.mubr.msk.f32.mxu1 %vm4161_vm1, %v4160_v14  ;;  %v596_v57 = vld [vmem:[%s5091_s1 + $0x60] sm:$0xff] }
 0x2fc   :  { %3790 = vmatprep.subr.mxu1 %v4160_v14 }
 0x2fe   :  { %3783 = vmatmul.mubr.msk.f32.vlgmr.msra.gmra.mrb[8].mxu1 %vm273_vm2, %v676_v59 }
 0x2ff   :  { %v4059_v60 = vpop.eup %4058  ;;  %3792 = vmatprep.mubr.msk.f32.mxu1 %vm4161_vm1, %v4160_v14 }
 0x300   :  { %v440_v61 = vsel %vm273_vm2, %v4059_v60, 0.0 }
 0x301   :  { %441 = vadd.xlane.f32.xlu1 %v440_v61 }
 0x312   :  { %855 = vrot.lane.b32.xlu1 %v4308_v48, %s4162_s20 }
 0x316   :  { %1096 = vrot.lane.b32.xlu1 %v4261_v23, %s4163_s8 }
 0x31a   :  { %1174 = vrot.lane.b32.xlu1 %v4259_v20, %s4163_s8 }
 0x38e   :  { %v442_v62 = vpop.xlane.xlu1 %441 }
 0x38f   :  { %4060 = vrcp.f32 %v442_v62 }
 0x392   :  { %v856_v63 = vpop.permute.xlu1 %855 }
 0x393   :  { %3791 = vmatpush3.msra.mxu1 %v856_v63 }
 0x394   :  { %3805 = vmatprep.subr.mxu1 %v4160_v14 }
 0x396   :  { %v1097_v28 = vpop.permute.xlu1 %1096 }
 0x399   :  { %v4061_v0 = vpop.eup %4060 }
 0x39a   :  { %v448_v2 = vmul.f32 %v4061_v0, %v4059_v60  ;;  %v1175_v29 = vpop.permute.xlu1 %1174 }
 0x39c   :  { %3768 = vmatmul.mubr.msk.f32.vlgmr.msra.gmra.mrb[4].mxu0 %vm273_vm2, %v448_v2 }
 0x39d   :  { %3776 = vmatpush3.xpose.msk.msra.mxu0 %vm273_vm2, %v600_v1  ;;  %3777 = vmatprep.mubr.msk.f32.mxu0 %vm4161_vm1, %v4160_v14 }
 0x39e   :  { %3785 = vmatprep.subr.mxu0 %v4160_v14 }
 0x3a0   :  { %3778 = vmatmul.mubr.msk.f32.vlgmr.msra.gmra.mrb[6].mxu0 %vm273_vm2, %v598_v3 }
 0x3a1   :  { %3787 = vmatprep.mubr.msk.f32.mxu0 %vm4161_vm1, %v4160_v14 }
 0x3cd   :  { %v4347_v4 = vpop.f32.mrb[6].mxu1 }
 0x3ce   :  { %v3774_v5 = vpop.f32.mrb[7].mxu1 }
 0x3d1   :  { %v749_v6 = vpop.f32.mrb[8].mxu1 }
 0x3d2   :  { %v754_v7 = vmul.f32 0.35355338, %v749_v6  ;;  %v3784_v8 = vpop.f32.mrb[9].mxu1 }
 0x3d4   :  { %v758_v9 = vsel %vm273_vm2, %v754_v7, -inf }
 0x3d5   :  { %759 = vmax.xlane.f32.xlu0 %v758_v9 }
 0x3eb   :  { %1094 = vrot.lane.b32.xlu0 %v4267_v26, %s4163_s8 }
 0x462   :  { %v760_v10 = vpop.xlane.xlu0 %759 }
 0x463   :  { %v762_v12 = vsub.f32 %v754_v7, %v760_v10 }
 0x465   :  { %v765_v15 = vmul.f32 1.442695, %v762_v12 }
 0x466   :  { %v1095_v33 = vpop.permute.xlu0 %1094 }
 0x467   :  { %4062 = vpow2.f32 %v765_v15 }
 0x46f   :  { %v4352_v16 = vpop.f32.mrb[4].mxu0 }
 0x470   :  { %v3769_v17 = vpop.f32.mrb[5].mxu0 }
 0x471   :  { %v4063_v18 = vpop.eup %4062 }
 0x472   :  { %v770_v19 = vsel %vm273_vm2, %v4063_v18, 0.0 }
 0x473   :  { %v671_v21 = vpop.f32.mrb[6].mxu0  ;;  %771 = vadd.xlane.f32.xlu1 %v770_v19 }
 0x474   :  { %v3779_v22 = vpop.f32.mrb[7].mxu0  ;;  %v753_v24 = vmul.f32 0.35355338, %v671_v21 }
 0x476   :  { %v755_v27 = vsel %vm273_vm2, %v753_v24, -inf }
 0x484   :  { %1172 = vrot.lane.b32.xlu1 %v4265_v25, %s4163_s8 }
 0x4a8   :  { %756 = vmax.xlane.f32.xlu1 %v755_v27 }
 0x4b9   :  { %778 = vrot.lane.b32.xlu1 %v4315_v51, %s4162_s20 }
 0x500   :  { %v772_v30 = vpop.xlane.xlu1 %771 }
 0x501   :  { %4064 = vrcp.f32 %v772_v30 }
 0x504   :  { %v1173_v34 = vpop.permute.xlu1 %1172 }
 0x50b   :  { %v4065_v31 = vpop.eup %4064 }
 0x50c   :  { %v776_v32 = vmul.f32 %v4065_v31, %v4063_v18 }
 0x50e   :  { %3793 = vmatmul.mubr.msk.f32.vlgmr.msra.gmra.mrb[10].mxu1 %vm273_vm2, %v776_v32 }
 0x50f   :  { %3806 = vmatpush3.xpose.msk.msra.mxu1 %vm273_vm2, %v1097_v28  ;;  %3807 = vmatprep.mubr.msk.f32.mxu1 %vm4161_vm1, %v4160_v14 }
 0x510   :  { %3810 = vmatprep.subr.mxu1 %v4160_v14 }
 0x512   :  { %3808 = vmatmul.mubr.msk.f32.vlgmr.msra.gmra.mrb[12].mxu1 %vm273_vm2, %v1095_v33 }
 0x513   :  { %3811 = vmatpush3.xpose.msk.msra.mxu1 %vm273_vm2, %v1175_v29  ;;  %3812 = vmatprep.mubr.msk.f32.mxu1 %vm4161_vm1, %v4160_v14 }
 0x514   :  { %3820 = vmatprep.subr.mxu1 %v4160_v14 }
 0x516   :  { %3813 = vmatmul.mubr.msk.f32.vlgmr.msra.gmra.mrb[14].mxu1 %vm273_vm2, %v1173_v34 }
 0x517   :  { %3822 = vmatprep.mubr.msk.f32.mxu1 %vm4161_vm1, %v4160_v14 }
 0x535   :  { %v757_v35 = vpop.xlane.xlu1 %756 }
 0x536   :  { %v761_v36 = vsub.f32 %v753_v24, %v757_v35 }
 0x538   :  { %v763_v37 = vmul.f32 1.442695, %v761_v36 }
 0x539   :  { %v779_v38 = vpop.permute.xlu1 %778 }
 0x53a   :  { %4066 = vpow2.f32 %v763_v37  ;;  %3786 = vmatpush3.msra.mxu0 %v779_v38 }
 0x53b   :  { %3795 = vmatprep.subr.mxu0 %v931_v56 }
 0x544   :  { %v4067_v39 = vpop.eup %4066 }
 0x545   :  { %v767_v40 = vsel %vm273_vm2, %v4067_v39, 0.0 }
 0x546   :  { %768 = vadd.xlane.f32.xlu0 %v767_v40 }
 0x5d3   :  { %v769_v41 = vpop.xlane.xlu0 %768 }
 0x5d4   :  { %4068 = vrcp.f32 %v769_v41 }
 0x5de   :  { %v4069_v42 = vpop.eup %4068 }
 0x5df   :  { %v775_v43 = vmul.f32 %v4069_v42, %v4067_v39 }
 0x5e1   :  { %3788 = vmatmul.mubr.msk.f32.vlgmr.msra.gmra.mrb[8].mxu0 %vm273_vm2, %v775_v43  ;;  %v927_v44 = vpop.f32.mrb[10].mxu1 }
 0x5e2   :  { %v3794_v45 = vpop.f32.mrb[11].mxu1  ;;  %3796 = vmatpush3.msra.mxu0 %v931_v56  ;;  %v1927_v56 = vld [vmem:[%s5091_s1 + $0xf8] sm:$0xff] }
 0x5e3   :  { %3800 = vmatprep.subr.mxu0 %v596_v57 }
 0x5e5   :  { %v1168_v46 = vpop.f32.mrb[12].mxu1 }
 0x5e6   :  { %v1250_v47 = vmul.f32 0.35355338, %v1168_v46  ;;  %v3809_v49 = vpop.f32.mrb[13].mxu1 }
 0x5e8   :  { %v1252_v50 = vsel %vm273_vm2, %v1250_v47, -inf }
 0x5e9   :  { %1253 = vmax.xlane.f32.xlu0 %v1252_v50  ;;  %v1246_v52 = vpop.f32.mrb[14].mxu1 }
 0x5ea   :  { %v1251_v53 = vmul.f32 0.35355338, %v1246_v52  ;;  %v3814_v54 = vpop.f32.mrb[15].mxu1  ;;  %v1842_v52 = vld [vmem:[%s5091_s1 + $0x78] sm:$0xff] }
 0x5ec   :  { %v1255_v55 = vsel %vm273_vm2, %v1251_v53, -inf }
 0x5ed   :  { %1256 = vmax.xlane.f32.xlu0 %v1255_v55 }
 0x676   :  { %v1254_v58 = vpop.xlane.xlu0 %1253 }
 0x677   :  { %v1258_v59 = vsub.f32 %v1250_v47, %v1254_v58 }
 0x679   :  { %v1260_v60 = vmul.f32 1.442695, %v1258_v59 }
 0x67a   :  { %v1257_v61 = vpop.xlane.xlu0 %1256 }
 0x67b   :  { %4070 = vpow2.f32 %v1260_v60  ;;  %v1259_v62 = vsub.f32 %v1251_v53, %v1257_v61 }
 0x67d   :  { %v1262_v63 = vmul.f32 1.442695, %v1259_v62 }
 0x67f   :  { %4072 = vpow2.f32 %v1262_v63 }
 0x685   :  { %v4071_v0 = vpop.eup %4070 }
 0x686   :  { %v1264_v1 = vsel %vm273_vm2, %v4071_v0, 0.0 }
 0x687   :  { %1265 = vadd.xlane.f32.xlu0 %v1264_v1 }
 0x689   :  { %v4073_v2 = vpop.eup %4072 }
 0x68a   :  { %v1267_v3 = vsel %vm273_vm2, %v4073_v2, 0.0 }
 0x68b   :  { %1268 = vadd.xlane.f32.xlu1 %v1267_v3 }
 0x69c   :  { %1510 = vrot.lane.b32.xlu1 %v4267_v26, %s4164_s13 }
 0x69d   :  { %1274 = vrot.lane.b32.xlu0 %v4315_v51, %s4163_s8 }
 0x6a1   :  { %1350 = vrot.lane.b32.xlu0 %v4308_v48, %s4163_s8 }
 0x6a5   :  { %1512 = vrot.lane.b32.xlu0 %v4261_v23, %s4164_s13  ;;  %v1426_v23 = vld [vmem:[%s5091_s1 + $0x70] sm:$0xff] }
 0x6a9   :  { %1590 = vrot.lane.b32.xlu0 %v4259_v20, %s4164_s13 }
 0x6ad   :  { %1588 = vrot.lane.b32.xlu0 %v4265_v25, %s4164_s13 }
 0x6b4   :  { %v850_v5 = vpop.f32.mrb[8].mxu0 }
 0x6b5   :  { %v3789_v6 = vpop.f32.mrb[9].mxu0  ;;  %3797 = vmatprep.mubr.msk.f32.mxu0 %vm273_vm2, %v850_v5 }
 0x6b6   :  { %3798 = vmatmul.mubr.msk.f32.vlgmr.msra.gmra.mrb[10].mxu0 %vm273_vm2, %v927_v44 }
 0x6b7   :  { %3802 = vmatprep.mubr.msk.f32.mxu0 %vm273_vm2, %v4352_v16  ;;  %3801 = vmatpush3.msra.mxu0 %v596_v57  ;;  %v1926_v57 = vld [vmem:[%s5091_s1 + $0xf0] sm:$0xff] }
 0x6b8   :  { %3815 = vmatprep.subr.mxu0 %v4160_v14 }
 0x6be   :  { %3803 = vmatmul.mubr.msk.f32.vlgmr.msra.gmra.mrb[10].mxu0 %vm273_vm2, %v4347_v4 }
 0x6bf   :  { %3817 = vmatprep.mubr.msk.f32.mxu0 %vm4161_vm1, %v4160_v14 }
 0x714   :  { %v1266_v20 = vpop.xlane.xlu0 %1265 }
 0x715   :  { %4074 = vrcp.f32 %v1266_v20 }
 0x718   :  { %v1269_v25 = vpop.xlane.xlu1 %1268  ;;  %v1275_v26 = vpop.permute.xlu0 %1274 }
 0x719   :  { %4076 = vrcp.f32 %v1269_v25  ;;  %3816 = vmatpush3.msra.mxu0 %v1275_v26 }
 0x71a   :  { %3825 = vmatprep.subr.mxu0 %v1426_v23 }
 0x71c   :  { %v1351_v7 = vpop.permute.xlu0 %1350  ;;  %v1511_v15 = vpop.permute.xlu1 %1510 }
 0x71d   :  { %3821 = vmatpush3.msra.mxu1 %v1351_v7 }
 0x71e   :  { %3830 = vmatprep.subr.mxu1 %v4160_v14 }
 0x71f   :  { %v4075_v8 = vpop.eup %4074 }
 0x720   :  { %v1272_v4 = vmul.f32 %v4075_v8, %v4071_v0  ;;  %v1513_v12 = vpop.permute.xlu0 %1512  ;;  %v1968_v8 = vld [vmem:[%s5093_s3 + $0x8] sm:$0xff] }
 0x722   :  { %3818 = vmatmul.mubr.msk.f32.vlgmr.msra.gmra.mrb[12].mxu0 %vm273_vm2, %v1272_v4 }
 0x723   :  { %v4077_v9 = vpop.eup %4076  ;;  %3826 = vmatpush3.msra.mxu0 %v1426_v23 }
 0x724   :  { %v1273_v10 = vmul.f32 %v4077_v9, %v4073_v2  ;;  %3835 = vmatprep.subr.mxu0 %v4160_v14  ;;  %v1591_v18 = vpop.permute.xlu0 %1590  ;;  %v1969_v9 = vld [vmem:[%s5093_s3 + $0x10] sm:$0xff] }
 0x726   :  { %3823 = vmatmul.mubr.msk.f32.vlgmr.msra.gmra.mrb[16].mxu1 %vm273_vm2, %v1273_v10  ;;  %v1970_v10 = vld [vmem:[%s5093_s3 + $0x18] sm:$0xff] }
 0x727   :  { %3831 = vmatpush3.xpose.msk.msra.mxu1 %vm273_vm2, %v1513_v12  ;;  %3832 = vmatprep.mubr.msk.f32.mxu1 %vm4161_vm1, %v4160_v14  ;;  %v3970_v12 = vpack.c.bf16 %v1970_v10, %v1969_v9 }
 0x728   :  { %3840 = vmatprep.subr.mxu1 %v4160_v14  ;;  %v1589_v22 = vpop.permute.xlu0 %1588 }
 0x72a   :  { %3833 = vmatmul.mubr.msk.f32.vlgmr.msra.gmra.mrb[18].mxu1 %vm273_vm2, %v1511_v15 }
 0x72b   :  { %3842 = vmatprep.mubr.msk.f32.mxu1 %vm4161_vm1, %v4160_v14 }
 0x7f5   :  { %v1346_v16 = vpop.f32.mrb[12].mxu0 }
 0x7f6   :  { %v3819_v17 = vpop.f32.mrb[13].mxu0  ;;  %3827 = vmatprep.mubr.msk.f32.mxu0 %vm273_vm2, %v1346_v16 }
 0x7f9   :  { %v1422_v19 = vpop.f32.mrb[16].mxu1 }
 0x7fa   :  { %v3824_v21 = vpop.f32.mrb[17].mxu1  ;;  %3828 = vmatmul.mubr.msk.f32.vlgmr.msra.gmra.mrb[10].mxu0 %vm273_vm2, %v1422_v19 }
 0x7fb   :  { %3836 = vmatpush3.xpose.msk.msra.mxu0 %vm273_vm2, %v1591_v18  ;;  %3837 = vmatprep.mubr.msk.f32.mxu0 %vm4161_vm1, %v4160_v14 }
 0x7fc   :  { %3845 = vmatprep.subr.mxu0 %v4160_v14 }
 0x7fd   :  { %v1584_v24 = vpop.f32.mrb[18].mxu1 }
 0x7fe   :  { %v1666_v27 = vmul.f32 0.35355338, %v1584_v24  ;;  %v3834_v28 = vpop.f32.mrb[19].mxu1  ;;  %3838 = vmatmul.mubr.msk.f32.vlgmr.msra.gmra.mrb[14].mxu0 %vm273_vm2, %v1589_v22  ;;  %v1932_v24 = vld [vmem:[%s5091_s1 + $0x100] sm:$0xff] }
 0x7ff   :  { %3847 = vmatprep.mubr.msk.f32.mxu0 %vm4161_vm1, %v4160_v14  ;;  %v1934_v28 = vld [vmem:[%s5091_s1 + $0x110] sm:$0xff]  ;;  %vm3398_vm1 = vcmask 1042434  }
 0x800   :  { %v1668_v29 = vsel %vm273_vm2, %v1666_v27, -inf }
 0x801   :  { %1669 = vmax.xlane.f32.xlu0 %v1668_v29 }
 0x88e   :  { %v1670_v30 = vpop.xlane.xlu0 %1669 }
 0x88f   :  { %v1674_v31 = vsub.f32 %v1666_v27, %v1670_v30 }
 0x891   :  { %v1676_v32 = vmul.f32 1.442695, %v1674_v31  ;;  %v1933_v31 = vld [vmem:[%s5091_s1 + $0x108] sm:$0xff] }
 0x893   :  { %4078 = vpow2.f32 %v1676_v32 }
 0x89d   :  { %v4079_v33 = vpop.eup %4078 }
 0x89e   :  { %v1680_v34 = vsel %vm273_vm2, %v4079_v33, 0.0 }
 0x89f   :  { %1681 = vadd.xlane.f32.xlu0 %v1680_v34  ;;  %v1935_v34 = vld [vmem:[%s5091_s1 + $0x118] sm:$0xff] }
 0x8d1   :  { %v1662_v35 = vpop.f32.mrb[14].mxu0 }
 0x8d2   :  { %v1667_v36 = vmul.f32 0.35355338, %v1662_v35  ;;  %v3839_v37 = vpop.f32.mrb[15].mxu0 }
 0x8d3   :  { %v2147_v37 = vld [vmem:[%s5092_s2 + $0x8] sm:$0xff] }
 0x8d4   :  { %v1671_v38 = vsel %vm273_vm2, %v1667_v36, -inf }
 0x8d5   :  { %1672 = vmax.xlane.f32.xlu1 %v1671_v38  ;;  %v2148_v38 = vld [vmem:[%s5092_s2 + $0x10] sm:$0xff] }
 0x8e6   :  { %1766 = vrot.lane.b32.xlu1 %v4308_v48, %s4164_s13 }
 0x92c   :  { %v1682_v44 = vpop.xlane.xlu0 %1681 }
 0x962   :  { %v1673_v14 = vpop.xlane.xlu1 %1672 }
 0x963   :  { %v1675_v39 = vsub.f32 %v1667_v36, %v1673_v14  ;;  %v3974_v14 = vpack.c.bf16 %v2148_v38, %v2147_v37  ;;  %v2123_v37 = vld [vmem:[%s5092_s2 + $0x68] sm:$0xff]  ;;  %v2124_v38 = vld [vmem:[%s5092_s2 + $0x70] sm:$0xff] }
 0x965   :  { %v1678_v40 = vmul.f32 1.442695, %v1675_v39  ;;  %v2269_v39 = vld [vmem:[%s5094_s4] sm:$0xff] }
 0x966   :  { %v1767_v41 = vpop.permute.xlu1 %1766 }
 0x967   :  { %4080 = vpow2.f32 %v1678_v40  ;;  %3846 = vmatpush3.msra.mxu0 %v1767_v41  ;;  %v2270_v40 = vld [vmem:[%s5094_s4 + $0x8] sm:$0xff] }
 0x968   :  { %4082 = vrcp.f32 %v1682_v44  ;;  %3850 = vmatprep.subr.mxu0 %v1842_v52  ;;  %v3990_v41 = vpack.c.bf16 %v2270_v40, %v2269_v39  ;;  %v2271_v44 = vld [vmem:[%s5094_s4 + $0x10] sm:$0xff] }
 0x971   :  { %v4081_v42 = vpop.eup %4080 }
 0x972   :  { %v1683_v43 = vsel %vm273_vm2, %v4081_v42, 0.0  ;;  %v4083_v46 = vpop.eup %4082 }
 0x973   :  { %1684 = vadd.xlane.f32.xlu0 %v1683_v43  ;;  %v1688_v47 = vmul.f32 %v4083_v46, %v4079_v33  ;;  %v2150_v43 = vld [vmem:[%s5092_s2 + $0x20] sm:$0xff]  ;;  %v2272_v46 = vld [vmem:[%s5094_s4 + $0x18] sm:$0xff] }
 0x989   :  { %1690 = vrot.lane.b32.xlu0 %v4315_v51, %s4164_s13 }
 0xa00   :  { %v1685_v45 = vpop.xlane.xlu0 %1684 }
 0xa01   :  { %4084 = vrcp.f32 %v1685_v45 }
 0xa04   :  { %v1691_v48 = vpop.permute.xlu0 %1690 }
 0xa05   :  { %3841 = vmatpush3.msra.mxu1 %v1691_v48  ;;  %v2152_v48 = vld [vmem:[%s5092_s2 + $0x30] sm:$0xff] }
 0xa06   :  { %3843 = vmatmul.mubr.msk.f32.vlgmr.msra.gmra.mrb[20].mxu1 %vm273_vm2, %v1688_v47  ;;  %v2151_v47 = vld [vmem:[%s5092_s2 + $0x28] sm:$0xff] }
 0xa0b   :  { %v4085_v49 = vpop.eup %4084 }
 0xa0c   :  { %v1689_v50 = vmul.f32 %v4085_v49, %v4081_v42  ;;  %v2149_v42 = vld [vmem:[%s5092_s2 + $0x18] sm:$0xff]  ;;  %v3994_v49 = vpack.c.bf16 %v2272_v46, %v2271_v44 }
 0xa0d   :  { %v3978_v45 = vpack.c.bf16 %v2150_v43, %v2149_v42 }
 0xa0e   :  { %3848 = vmatmul.mubr.msk.f32.vlgmr.msra.gmra.mrb[16].mxu0 %vm273_vm2, %v1689_v50  ;;  %v3982_v50 = vpack.c.bf16 %v2152_v48, %v2151_v47  ;;  %v2129_v48 = vld [vmem:[%s5092_s2 + $0x88] sm:$0xff] }
 0xa0f   :  { %3851 = vmatpush3.msra.mxu0 %v1842_v52  ;;  %v2273_v52 = vld [vmem:[%s5094_s4 + $0x20] sm:$0xff] }
 0xa10   :  { %3975 = vmatprep.subr.bf16.mxu0 %v3974_v14 }
 0xad9   :  { %v1762_v51 = vpop.f32.mrb[20].mxu1 }
 0xada   :  { %v3844_v53 = vpop.f32.mrb[21].mxu1  ;;  %3852 = vmatprep.mubr.msk.f32.mxu0 %vm273_vm2, %v1762_v51  ;;  %v2274_v51 = vld [vmem:[%s5094_s4 + $0x28] sm:$0xff] }
 0xadb   :  { %v2153_v53 = vld [vmem:[%s5092_s2 + $0x38] sm:$0xff] }
 0xae1   :  { %v1838_v54 = vpop.f32.mrb[16].mxu0 }
 0xae2   :  { %v3849_v55 = vpop.f32.mrb[17].mxu0  ;;  %3853 = vmatmul.mubr.msk.f32.vlgmr.msra.gmra.mrb[10].mxu0 %vm273_vm2, %v1838_v54  ;;  %v3998_v54 = vpack.c.bf16 %v2274_v51, %v2273_v52  ;;  %vm3401_vm2 = vcmask 1043459  }
 0xae3   :  { %3977 = vmatpush3.bf16.msra.mxu0 %v3974_v14  ;;  %v2154_v55 = vld [vmem:[%s5092_s2 + $0x40] sm:$0xff] }
 0xae4   :  { %3979 = vmatprep.subr.bf16.mxu0 %v3978_v45 }
 0xae7   :  { %3981 = vmatpush3.bf16.msra.mxu0 %v3978_v45 }
 0xae8   :  { %3983 = vmatprep.subr.bf16.mxu0 %v3982_v50 }
 0xaeb   :  { %3985 = vmatpush3.bf16.msra.mxu0 %v3982_v50 }
 0xbb5   :  { %v3854_v58 = vpop.f32.mrb[10].mxu0 }
 0xbb6   :  { %v1929_v59 = vadd.f32 %v3854_v58, %v1927_v56  ;;  %v1915_v60 = vpop.f32.mrb[11].mxu0  ;;  %v2275_v56 = vld [vmem:[%s5094_s4 + $0x30] sm:$0xff]  ;;  %v3986_v58 = vpack.c.bf16 %v2154_v55, %v2153_v53 }
 0xbb7   :  { %v1928_v61 = vadd.f32 %v1926_v57, %v1915_v60  ;;  %v2276_v57 = vld [vmem:[%s5094_s4 + $0x38] sm:$0xff]  ;;  %v2352_v60 = vld [vmem:[%s5094_s4 + $0x40] sm:$0xff] }
 0xbb8   :  { %v1931_v62 = vadd.f32 %v1929_v59, %v4236_v13  ;;  %v4002_v59 = vpack.c.bf16 %v2276_v57, %v2275_v56  ;;  %3987 = vmatprep.subr.bf16.mxu0 %v3986_v58 }
 0xbb9   :  { %v1930_v63 = vadd.f32 %v1928_v61, %v4227_v11  ;;  %v1967_v11 = vld [vmem:[%s5093_s3] sm:$0xff]  ;;  %3989 = vmatpush3.bf16.msra.mxu0 %v3986_v58  ;;  %v2353_v61 = vld [vmem:[%s5094_s4 + $0x48] sm:$0xff] }
 0xbba   :  { %v1939_v0 = vsel %vm29_vm0, %v1931_v62, 0.0  ;;  %v3966_v4 = vpack.c.bf16 %v1968_v8, %v1967_v11  ;;  %v2079_v11 = vld [vmem:[%s5092_s2 + $0x50] sm:$0xff] }
 0xbbb   :  { %1940 = vadd.xlane.f32.xlu1 %v1939_v0  ;;  %v1936_v1 = vsel %vm29_vm0, %v1930_v63, 0.0 }
 0xbbc   :  { %1937 = vadd.xlane.f32.xlu0 %v1936_v1  ;;  %3967 = vmatprep.subr.bf16.mxu1 %v3966_v4 }
 0xbbd   :  { %3969 = vmatpush3.bf16.msra.mxu1 %v3966_v4 }
 0xbbe   :  { %3971 = vmatprep.subr.bf16.mxu1 %v3970_v12 }
 0xbc1   :  { %3973 = vmatpush3.bf16.msra.mxu1 %v3970_v12 }
 0xbc2   :  { %3991 = vmatprep.subr.bf16.mxu1 %v3990_v41 }
 0xc48   :  { %v1941_v2 = vpop.xlane.xlu1 %1940 }
 0xc49   :  { %v1944_v3 = vmul.f32 0.03125, %v1941_v2  ;;  %v1938_v5 = vpop.xlane.xlu0 %1937 }
 0xc4a   :  { %v1943_v6 = vmul.f32 0.03125, %v1938_v5 }
 0xc4b   :  { %v1946_v20 = vsub.f32 %v1931_v62, %v1944_v3  ;;  %v4542_v62 = vpack.c.bf16 %v2353_v61, %v2352_v60  ;;  %v2354_v60 = vld [vmem:[%s5094_s4 + $0x50] sm:$0xff]  ;;  %v2355_v61 = vld [vmem:[%s5094_s4 + $0x58] sm:$0xff] }
 0xc4c   :  { %v1945_v23 = vsub.f32 %v1930_v63, %v1943_v6  ;;  %v2061_v63 = vlaneseq  ;;  %v2067_v6 = vld [vmem:[%s5092_s2 + $0x80] sm:$0xff] }
 0xc4d   :  { %v1948_v7 = vmul.f32 %v1946_v20, %v1946_v20  ;;  %4007 = vmatprep.subr.bf16.mxu0 %v4542_v62 }
 0xc4e   :  { %v1947_v25 = vmul.f32 %v1945_v23, %v1945_v23  ;;  %v4545_v0 = vshrl.u32 %v2061_v63, 7 }
 0xc4f   :  { %v1952_v13 = vsel %vm29_vm0, %v1948_v7, 0.0 }
 0xc50   :  { %v1949_v26 = vsel %vm29_vm0, %v1947_v25, 0.0  ;;  %v2063_v1 = vadd.s32 8, %v4545_v0  ;;  %v2064_v2 = vand.u32 7, %v4545_v0  ;;  %v2066_v25 = vld [vmem:[%s5092_s2 + $0x78] sm:$0xff] }
 0xc51   :  { %1950 = vadd.xlane.f32.xlu0 %v1949_v26 }
 0xc52   :  { %v2065_v3 = vand.u32 7, %v2063_v1  ;;  %vm2070_vm4 = vcmp.ge.s32.totalorder %v2064_v2, 3  ;;  %vm2084_vm8 = vcmp.ge.s32.totalorder %v2064_v2, 2  ;;  %vm2107_vm10 = vcmp.ge.s32.totalorder %v2064_v2, 1 }
 0xc54   :  { %vm2071_vm5 = vcmp.ge.s32.totalorder %v2065_v3, 3  ;;  %vm2085_vm9 = vcmp.ge.s32.totalorder %v2065_v3, 2  ;;  %vm2108_vm11 = vcmp.ge.s32.totalorder %v2065_v3, 1 }
 0xc55   :  { %1953 = vadd.xlane.f32.xlu0 %v1952_v13  ;;  %v2078_v13 = vld [vmem:[%s5092_s2 + $0x48] sm:$0xff] }
 0xcde   :  { %v1951_v15 = vpop.xlane.xlu0 %1950 }
 0xcdf   :  { %v1955_v16 = vmul.f32 0.03125, %v1951_v15 }
 0xce1   :  { %v1957_v17 = vadd.f32 1e-05, %v1955_v16 }
 0xce2   :  { %v1954_v18 = vpop.xlane.xlu0 %1953 }
 0xce3   :  { %4086 = vrsqrt.f32 %v1957_v17  ;;  %v1956_v19 = vmul.f32 0.03125, %v1954_v18 }
 0xce5   :  { %v1958_v21 = vadd.f32 1e-05, %v1956_v19 }
 0xce7   :  { %4088 = vrsqrt.f32 %v1958_v21  ;;  %v2101_v21 = vld [vmem:[%s5092_s2 + $0x58] sm:$0xff] }
 0xced   :  { %v4087_v22 = vpop.eup %4086 }
 0xcee   :  { %v1961_v27 = vmul.f32 %v4087_v22, %v1945_v23  ;;  %v2102_v22 = vld [vmem:[%s5092_s2 + $0x60] sm:$0xff] }
 0xcf0   :  { %v1963_v29 = vmul.f32 %v1961_v27, %v1932_v24 }
 0xcf1   :  { %v4089_v30 = vpop.eup %4088 }
 0xcf2   :  { %v1962_v32 = vmul.f32 %v4089_v30, %v1946_v20  ;;  %v4477_v33 = vadd.f32 %v1963_v29, %v1934_v28 }
 0xcf4   :  { %3863 = vmatprep.mubr.msk.f32.mxu1 %vm29_vm0, %v4477_v33  ;;  %v1964_v35 = vmul.f32 %v1962_v32, %v1933_v31 }
 0xcf6   :  { %v4484_v36 = vadd.f32 %v1964_v35, %v1935_v34 }
 0xcf8   :  { %3864 = vmatmul.mubr.msk.f32.vlgmr.msra.gmra.mrb[22].mxu1 %vm29_vm0, %v4484_v36 }
 0xcf9   :  { %3993 = vmatpush3.bf16.msra.mxu1 %v3990_v41 }
 0xcfa   :  { %3995 = vmatprep.subr.bf16.mxu1 %v3994_v49 }
 0xcfd   :  { %3997 = vmatpush3.bf16.msra.mxu1 %v3994_v49  ;;  %v2130_v49 = vld [vmem:[%s5092_s2 + $0x90] sm:$0xff] }
 0xcfe   :  { %3999 = vmatprep.subr.bf16.mxu1 %v3998_v54 }
 0xd01   :  { %4001 = vmatpush3.bf16.msra.mxu1 %v3998_v54 }
 0xd02   :  { %4003 = vmatprep.subr.bf16.mxu1 %v4002_v59 }
 0xd05   :  { %4005 = vmatpush3.bf16.msra.mxu1 %v4002_v59 }
 0xdcb   :  { %v4549_v5 = vpop.f32.mrb[22].mxu1 }
 0xdcc   :  { %v2056_v20 = vrot.slane %v4549_v5, 5  ;;  %v4555_v23 = vpop.f32.mrb[23].mxu1  ;;  %v2069_v7 = vmul.f32 %v4549_v5, %v2067_v6  ;;  %v4010_v6 = vpack.c.bf16 %v2355_v61, %v2354_v60 }
 0xdcd   :  { %v2055_v26 = vrot.slane %v4555_v23, 5  ;;  %v2068_v10 = vmul.f32 %v2066_v25, %v4555_v23  ;;  %v2357_v25 = vld [vmem:[%s5094_s4 + $0x68] sm:$0xff] }
 0xdce   :  { %v2095_v8 = vrot.slane %v2056_v20, 1  ;;  %v2117_v28 = vrot.slane %v2056_v20, 2 }
 0xdcf   :  { %v2057_v4 = vsel %vm2054_vm3, %v2055_v26, %v2056_v20  ;;  %v2060_v9 = vsel %vm2054_vm3, 0.0, %v2055_v26  ;;  %v2356_v20 = vld [vmem:[%s5094_s4 + $0x60] sm:$0xff]  ;;  %vm3404_vm3 = vcmask 1044484  }
 0xdd0   :  { %v2076_v12 = vsel %vm2070_vm4, %v2060_v9, 0.0  ;;  %v2077_v15 = vsel %vm2071_vm5, %v2057_v4, 0.0  ;;  %v2092_v16 = vrot.slane %v2060_v9, 1  ;;  %v2093_v17 = vrot.slane %v2057_v4, 1 }
 0xdd1   :  { %v2080_v18 = vmul.f32 %v2078_v13, %v2076_v12  ;;  %v2081_v19 = vmul.f32 %v2079_v11, %v2077_v15  ;;  %v2114_v24 = vrot.slane %v2060_v9, 2  ;;  %v2115_v27 = vrot.slane %v2057_v4, 2  ;;  %v2359_v13 = vld [vmem:[%s5094_s4 + $0x78] sm:$0xff]  ;;  %v2156_v4 = vld [vmem:[%s5092_s2 + $0xa0] sm:$0xff] }
 0xdd2   :  { %v2094_v29 = vsel %vm2091_vm6, %v2092_v16, %v2093_v17  ;;  %v2096_v30 = vsel %vm2091_vm6, %v2093_v17, %v2095_v8  ;;  %v4014_v26 = vpack.c.bf16 %v2357_v25, %v2356_v20  ;;  %v4633_v8 = vsub.s32 1, %v4545_v0  ;;  %v2435_v9 = vld [vmem:[%s5092_s2] sm:$0xff] }
 0xdd3   :  { %v2082_v31 = vadd.f32 %v2080_v18, %v2068_v10  ;;  %v2083_v32 = vadd.f32 %v2081_v19, %v2069_v7  ;;  %v2099_v34 = vsel %vm2084_vm8, %v2094_v29, 0.0  ;;  %v2100_v35 = vsel %vm2085_vm9, %v2096_v30, 0.0  ;;  %v2358_v7 = vld [vmem:[%s5094_s4 + $0x70] sm:$0xff] }
 0xdd4   :  { %v2103_v14 = vmul.f32 %v2101_v21, %v2099_v34  ;;  %v2104_v39 = vmul.f32 %v2102_v22, %v2100_v35  ;;  %v2116_v40 = vsel %vm2113_vm7, %v2114_v24, %v2115_v27  ;;  %v2118_v41 = vsel %vm2113_vm7, %v2115_v27, %v2117_v28 }
 0xdd5   :  { %v2121_v42 = vsel %vm2107_vm10, %v2116_v40, 0.0  ;;  %v2122_v43 = vsel %vm2108_vm11, %v2118_v41, 0.0  ;;  %v4018_v11 = vpack.c.bf16 %v2359_v13, %v2358_v7  ;;  %v4642_v15 = vsub.s32 2, %v4545_v0 }
 0xdd6   :  { %v2105_v44 = vadd.f32 %v2103_v14, %v2082_v31  ;;  %v2106_v45 = vadd.f32 %v2104_v39, %v2083_v32  ;;  %v2125_v46 = vmul.f32 %v2123_v37, %v2121_v42  ;;  %v2126_v47 = vmul.f32 %v2124_v38, %v2122_v43 }
 0xdd7   :  { %v4653_v22 = vsub.s32 4, %v4545_v0  ;;  %v2436_v24 = vmul.f32 1.442695, %v2435_v9  ;;  %v4657_v28 = vsub.s32 3, %v4545_v0  ;;  %v4662_v32 = vsub.s32 6, %v4545_v0 }
 0xdd8   :  { %v2127_v50 = vadd.f32 %v2125_v46, %v2105_v44  ;;  %v2128_v52 = vadd.f32 %v2126_v47, %v2106_v45  ;;  %v4667_v38 = vsub.s32 5, %v4545_v0  ;;  %v4670_v14 = vsub.s32 7, %v4545_v0 }
 0xdd9   :  { %vm3407_vm4 = vcmask 1045509   ;;  %vm3410_vm5 = vcmask 1046534   ;;  %vm3413_vm6 = vcmask 1047559  }
 0xdda   :  { %v2131_v51 = vadd.f32 %v2129_v48, %v2127_v50  ;;  %v2132_v53 = vadd.f32 %v2130_v49, %v2128_v52 }
 0xddc   :  { %v3602_v54 = vmul.f32 -1.442695, %v2131_v51  ;;  %v3603_v55 = vmul.f32 -1.442695, %v2132_v53 }
 0xdde   :  { %4090 = vpow2.f32 %v3602_v54 }
 0xddf   :  { %4092 = vpow2.f32 %v3603_v55 }
 0xde8   :  { %v4091_v56 = vpop.eup %4090 }
 0xde9   :  { %v4093_v57 = vpop.eup %4092  ;;  %v2139_v58 = vadd.f32 1.0, %v4091_v56 }
 0xdea   :  { %v2140_v59 = vadd.f32 1.0, %v4093_v57 }
 0xdeb   :  { %4094 = vrcp.f32 %v2139_v58 }
 0xdec   :  { %4096 = vrcp.f32 %v2140_v59 }
 0xded   :  { %4098 = vpow2.f32 %v2436_v24 }
 0xdf5   :  { %v4095_v63 = vpop.eup %4094 }
 0xdf6   :  { %v4097_v1 = vpop.eup %4096  ;;  %v4600_v2 = vmul.f32 %v4095_v63, %v2131_v51 }
 0xdf7   :  { %v4602_v3 = vmul.f32 %v4097_v1, %v2132_v53  ;;  %v4673_v40 = vpop.eup %4098 }
 0xdf8   :  { %3882 = vmatprep.mubr.msk.f32.mxu0 %vm2157_vm12, %v4600_v2  ;;  %3901 = vmatprep.mubr.msk.f32.mxu1 %vm2157_vm12, %v4600_v2  ;;  %v2438_v53 = vsub.f32 0.0, %v4673_v40 }
 0xdf9   :  { %3883 = vmatmul.mubr.msk.f32.vlgmr.msra.gmra.mrb[18].mxu0 %vm2157_vm12, %v4602_v3  ;;  %3902 = vmatmul.mubr.msk.f32.vlgmr.msra.gmra.mrb[24].mxu1 %vm2157_vm12, %v4602_v3 }
 0xdfa   :  { %4009 = vmatpush3.bf16.msra.mxu0 %v4542_v62  ;;  %3920 = vmatprep.mubr.msk.f32.mxu0 %vm2157_vm12, %v4600_v2  ;;  %v4630_v62 = vsub.s32 0, %v4545_v0 }
 0xdfb   :  { %4011 = vmatprep.subr.bf16.mxu0 %v4010_v6 }
 0xdfe   :  { %4013 = vmatpush3.bf16.msra.mxu0 %v4010_v6 }
 0xdff   :  { %4015 = vmatprep.subr.bf16.mxu0 %v4014_v26 }
 0xe02   :  { %4017 = vmatpush3.bf16.msra.mxu0 %v4014_v26 }
 0xe03   :  { %4019 = vmatprep.subr.bf16.mxu0 %v4018_v11 }
 0xe06   :  { %4021 = vmatpush3.bf16.msra.mxu0 %v4018_v11 }
 0xe09   :  { %3921 = vmatmul.mubr.msk.f32.vlgmr.msra.gmra.mrb[20].mxu0 %vm2157_vm12, %v4602_v3 }
 0xecc   :  { %v3884_v10 = vpop.f32.mrb[18].mxu0  ;;  %v3903_v12 = vpop.f32.mrb[24].mxu1 }
 0xecd   :  { %v4644_v16 = vadd.f32 %v3884_v10, %v2156_v4  ;;  %v4646_v17 = vpop.f32.mrb[19].mxu0  ;;  %v4648_v18 = vpop.f32.mrb[25].mxu1  ;;  %v2631_v19 = vrot.slane %v3903_v12, %v4633_v8  ;;  %v2624_v21 = vrot.slane %v3903_v12, %v4630_v62  ;;  %v2638_v30 = vrot.slane %v3903_v12, %v4642_v15 }
 0xece   :  { %v2652_v31 = vrot.slane %v3903_v12, %v4653_v22  ;;  %v2645_v35 = vrot.slane %v3903_v12, %v4657_v28  ;;  %v2666_v37 = vrot.slane %v3903_v12, %v4662_v32  ;;  %v2659_v39 = vrot.slane %v3903_v12, %v4667_v38 }
 0xecf   :  { %v2242_v27 = vand.u32 2147483647, %v4644_v16  ;;  %2633 = vbcast.lane.b32.xlu1 %v2631_v19, 256  ;;  %2626 = vbcast.lane.b32.xlu0 %v2624_v21, 256  ;;  %v2673_v42 = vrot.slane %v3903_v12, %v4670_v14  ;;  %v2240_v26 = vmax.f32 %v4644_v16, 0.0  ;;  %v2568_v11 = vrot.slane %v4648_v18, %v4630_v62 }
 0xed0   :  { %v2575_v4 = vrot.slane %v4648_v18, %v4633_v8  ;;  %v2582_v9 = vrot.slane %v4648_v18, %v4642_v15  ;;  %v2589_v10 = vrot.slane %v4648_v18, %v4657_v28  ;;  %v2596_v12 = vrot.slane %v4648_v18, %v4653_v22 }
 0xed1   :  { %v2244_v29 = vsub.f32 0.0, %v2242_v27  ;;  %v2603_v16 = vrot.slane %v4648_v18, %v4667_v38  ;;  %v2610_v19 = vrot.slane %v4648_v18, %v4662_v32  ;;  %v3610_v21 = vmul.f32 -1.442695, %v4555_v23 }
 0xed2   :  { %v2617_v24 = vrot.slane %v4648_v18, %v4670_v14  ;;  %v3611_v27 = vmul.f32 -1.442695, %v4549_v5 }
 0xed3   :  { %v2247_v34 = vmul.f32 1.442695, %v2244_v29  ;;  %2640 = vbcast.lane.b32.xlu1 %v2638_v30, 256  ;;  %2654 = vbcast.lane.b32.xlu0 %v2652_v31, 256 }
 0xed5   :  { %4100 = vpow2.f32 %v2247_v34  ;;  %v4166_v34 = vmov 1966171168  }
 0xed7   :  { %2647 = vbcast.lane.b32.xlu1 %v2645_v35, 256  ;;  %2668 = vbcast.lane.b32.xlu0 %v2666_v37, 256  ;;  %v2454_v35 = vunpack.c.l.s4 %v4166_v34 }
 0xed9   :  { %v2455_v37 = vunpack.c.0.s8 %v2454_v35  ;;  %v2155_v35 = vld [vmem:[%s5092_s2 + $0x98] sm:$0xff] }
 0xedb   :  { %2661 = vbcast.lane.b32.xlu1 %v2659_v39, 256 }
 0xedc   :  { %v4675_v41 = vpop.f32.mrb[20].mxu0 }
 0xedd   :  { %v4678_v43 = vpop.f32.mrb[21].mxu0  ;;  %v3064_v44 = vrot.slane %v4675_v41, %v4657_v28  ;;  %v3078_v45 = vrot.slane %v4675_v41, %v4667_v38  ;;  %v3050_v46 = vrot.slane %v4675_v41, %v4633_v8  ;;  %v3057_v47 = vrot.slane %v4675_v41, %v4642_v15 }
 0xede   :  { %v2994_v48 = vrot.slane %v4678_v43, %v4633_v8  ;;  %v3001_v49 = vrot.slane %v4678_v43, %v4642_v15  ;;  %v3008_v50 = vrot.slane %v4678_v43, %v4657_v28  ;;  %v3015_v52 = vrot.slane %v4678_v43, %v4653_v22 }
 0xedf   :  { %v4101_v51 = vpop.eup %4100  ;;  %2675 = vbcast.lane.b32.xlu1 %v2673_v42, 256  ;;  %v3022_v54 = vrot.slane %v4678_v43, %v4667_v38  ;;  %v3036_v55 = vrot.slane %v4678_v43, %v4670_v14  ;;  %v3071_v57 = vrot.slane %v4675_v41, %v4653_v22  ;;  %v3029_v58 = vrot.slane %v4678_v43, %v4662_v32 }
 0xee0   :  { %v2258_v56 = vadd.f32 1.0, %v4101_v51  ;;  %v3085_v59 = vrot.slane %v4675_v41, %v4662_v32  ;;  %v3092_v60 = vrot.slane %v4675_v41, %v4670_v14  ;;  %v2261_v61 = vmul.f32 -0.5, %v4101_v51 }
 0xee1   :  { %v2264_v1 = vand.u32 2147483647, %v4101_v51 }
 0xee2   :  { %4102 = vlog2.f32 %v2258_v56  ;;  %v2262_v63 = vadd.f32 1.0, %v2261_v61 }
 0xee3   :  { %2447 = vrot.lane.b32.xlu1 %v2438_v53, %s4165_s27  ;;  %vm2265_vm13 = vcmp.lt.f32.partialorder %v2264_v1, 0.0004427343  ;;  %4104 = vpow2.f32 %v3610_v21 }
 0xee4   :  { %v2263_v25 = vmul.f32 %v4101_v51, %v2262_v63  ;;  %4106 = vpow2.f32 %v3611_v27 }
 0xeec   :  { %v4103_v6 = vpop.eup %4102 }
 0xeed   :  { %v2260_v20 = vmul.f32 0.6931472, %v4103_v6  ;;  %v4105_v28 = vpop.eup %4104 }
 0xeee   :  { %v3282_v29 = vadd.f32 1.0, %v4105_v28  ;;  %v4107_v30 = vpop.eup %4106 }
 0xeef   :  { %v2266_v7 = vsel %vm2265_vm13, %v2263_v25, %v2260_v20  ;;  %v3283_v31 = vadd.f32 1.0, %v4107_v30 }
 0xef0   :  { %v2268_v13 = vadd.f32 %v2266_v7, %v2240_v26  ;;  %4108 = vrcp.f32 %v3282_v29 }
 0xef1   :  { %4110 = vrcp.f32 %v3283_v31 }
 0xef2   :  { %2442 = vrot.lane.b32.xlu0 %v2268_v13, %s4165_s27 }
 0xef6   :  { %2570 = vbcast.lane.b32.xlu0 %v2568_v11, 256 }
 0xefa   :  { %2577 = vbcast.lane.b32.xlu0 %v2575_v4, 256  ;;  %v4109_v18 = vpop.eup %4108 }
 0xefb   :  { %v4736_v39 = vmul.f32 %v4109_v18, %v4555_v23  ;;  %v4111_v42 = vpop.eup %4110 }
 0xefd   :  { %v3294_v23 = vrot.slane %v4736_v39, 3 }
 0xefe   :  { %2584 = vbcast.lane.b32.xlu0 %v2582_v9, 256 }
 0xf02   :  { %2591 = vbcast.lane.b32.xlu0 %v2589_v10, 256 }
 0xf06   :  { %2598 = vbcast.lane.b32.xlu0 %v2596_v12, 256 }
 0xf0a   :  { %2605 = vbcast.lane.b32.xlu0 %v2603_v16, 256 }
 0xf0e   :  { %2612 = vbcast.lane.b32.xlu0 %v2610_v19, 256 }
 0xf12   :  { %2619 = vbcast.lane.b32.xlu0 %v2617_v24, 256 }
 0xf16   :  { %2996 = vbcast.lane.b32.xlu0 %v2994_v48, 256  ;;  %v4739_v48 = vmul.f32 %v4111_v42, %v4549_v5 }
 0xf18   :  { %v3300_v32 = vrot.slane %v4739_v48, 2 }
 0xf1a   :  { %3003 = vbcast.lane.b32.xlu0 %v3001_v49, 256  ;;  %v2440_v49 = vmul.f32 %v2268_v13, %v4602_v3 }
 0xf1c   :  { %v2728_v63 = vcombine.high %v2440_v49, %v2440_v49 }
 0xf1e   :  { %3010 = vbcast.lane.b32.xlu0 %v3008_v50, 256  ;;  %v3292_v50 = vrot.slane %v4736_v39, 1 }
 0xf22   :  { %3017 = vbcast.lane.b32.xlu0 %v3015_v52, 256 }
 0xf26   :  { %3066 = vbcast.lane.b32.xlu0 %v3064_v44, 256  ;;  %v4742_v44 = vsub.s32 %v2455_v37, %v4545_v0 }
 0xf28   :  { %v2735_v38 = vrot.slane %v2440_v49, %v4742_v44  ;;  %v2742_v7 = vrot.slane %v2728_v63, %v4742_v44  ;;  %v2231_v49 = vadd.f32 %v4646_v17, %v2155_v35  ;;  %v3043_v17 = vrot.slane %v4675_v41, %v4630_v62 }
 0xf2a   :  { %3024 = vbcast.lane.b32.xlu0 %v3022_v54, 256  ;;  %v2743_v52 = vcombine.high %v2735_v38, %v2735_v38  ;;  %v2751_v5 = vrot.slane %v2735_v38, %v4742_v44  ;;  %v3295_v54 = vrot.slane %v4736_v39, 4  ;;  %v2758_v9 = vrot.slane %v2742_v7, %v4742_v44 }
 0xf2b   :  { %v2744_v12 = vcombine.high %v2742_v7, %v2742_v7 }
 0xf2c   :  { %v2765_v0 = vrot.slane %v2743_v52, %v4742_v44  ;;  %v2812_v51 = vrot.slane %v2751_v5, %v4630_v62  ;;  %v2773_v6 = vcombine.high %v2751_v5, %v2751_v5  ;;  %v2828_v21 = vrot.slane %v2758_v9, %v4630_v62 }
 0xf2d   :  { %v2772_v24 = vrot.slane %v2744_v12, %v4742_v44  ;;  %v2774_v29 = vcombine.high %v2758_v9, %v2758_v9  ;;  %v2987_v5 = vrot.slane %v4678_v43, %v4630_v62 }
 0xf2e   :  { %3080 = vbcast.lane.b32.xlu0 %v3078_v45, 256  ;;  %v3299_v45 = vrot.slane %v4739_v48, 1  ;;  %v2816_v1 = vrot.slane %v2765_v0, %v4630_v62  ;;  %v2820_v26 = vrot.slane %v2773_v6, %v4630_v62  ;;  %v2775_v13 = vcombine.high %v2765_v0, %v2765_v0 }
 0xf2f   :  { %v2832_v30 = vrot.slane %v2772_v24, %v4630_v62  ;;  %v2836_v18 = vrot.slane %v2774_v29, %v4630_v62  ;;  %v2776_v37 = vcombine.high %v2772_v24, %v2772_v24 }
 0xf30   :  { %v2824_v10 = vrot.slane %v2775_v13, %v4630_v62 }
 0xf31   :  { %v2840_v38 = vrot.slane %v2776_v37, %v4630_v62 }
 0xf32   :  { %3038 = vbcast.lane.b32.xlu0 %v3036_v55, 256 }
 0xf36   :  { %3308 = vrot.lane.b32.xlu0 %v3292_v50, %s4165_s27 }
 0xf3a   :  { %3324 = vrot.lane.b32.xlu0 %v3299_v45, %s4165_s27 }
 0xf3e   :  { %3312 = vrot.lane.b32.xlu0 %v3294_v23, %s4165_s27  ;;  %v2241_v23 = vand.u32 2147483647, %v2231_v49 }
 0xf40   :  { %v2243_v52 = vsub.f32 0.0, %v2241_v23 }
 0xf41   :  { %v2634_v55 = vpop.permute.xlu1 %2633  ;;  %v2627_v56 = vpop.permute.xlu0 %2626 }
 0xf42   :  { %v2865_v61 = vmul.f32 %v2812_v51, %v2627_v56  ;;  %3314 = vrot.lane.b32.xlu0 %v3295_v54, %s4165_s27  ;;  %v2866_v25 = vmul.f32 %v2816_v1, %v2634_v55  ;;  %v2245_v0 = vmul.f32 1.442695, %v2243_v52 }
 0xf44   :  { %2881 = vrot.lane.b32.xlu1 %v2865_v61, %s4165_s27  ;;  %4112 = vpow2.f32 %v2245_v0 }
 0xf45   :  { %v2641_v20 = vpop.permute.xlu1 %2640  ;;  %v2655_v19 = vpop.permute.xlu0 %2654 }
 0xf46   :  { %v2867_v11 = vmul.f32 %v2820_v26, %v2641_v20  ;;  %v2869_v27 = vmul.f32 %v2828_v21, %v2655_v19 }
 0xf48   :  { %2883 = vrot.lane.b32.xlu1 %v2866_v25, %s4165_s27 }
 0xf49   :  { %v2648_v4 = vpop.permute.xlu1 %2647  ;;  %v2669_v34 = vpop.permute.xlu0 %2668 }
 0xf4a   :  { %v2868_v16 = vmul.f32 %v2824_v10, %v2648_v4  ;;  %v2871_v42 = vmul.f32 %v2836_v18, %v2669_v34 }
 0xf4c   :  { %2885 = vrot.lane.b32.xlu1 %v2867_v11, %s4165_s27 }
 0xf4d   :  { %v2662_v28 = vpop.permute.xlu1 %2661 }
 0xf4e   :  { %v2870_v31 = vmul.f32 %v2832_v30, %v2662_v28  ;;  %v4113_v8 = vpop.eup %4112 }
 0xf4f   :  { %v2252_v22 = vmul.f32 -0.5, %v4113_v8  ;;  %v2255_v43 = vand.u32 2147483647, %v4113_v8 }
 0xf50   :  { %2887 = vrot.lane.b32.xlu1 %v2868_v16, %s4165_s27 }
 0xf51   :  { %v2676_v50 = vpop.permute.xlu1 %2675  ;;  %v2253_v51 = vadd.f32 1.0, %v2252_v22  ;;  %vm2256_vm14 = vcmp.lt.f32.partialorder %v2255_v43, 0.0004427343 }
 0xf52   :  { %v2872_v45 = vmul.f32 %v2840_v38, %v2676_v50 }
 0xf54   :  { %2889 = vrot.lane.b32.xlu1 %v2869_v27, %s4165_s27 }
 0xf55   :  { %v2448_v25 = vpop.permute.xlu1 %2447 }
 0xf56   :  { %v4820_v7 = vsel %vm2157_vm12, %v2438_v53, %v2448_v25 }
 0xf58   :  { %2891 = vrot.lane.b32.xlu1 %v2870_v31, %s4165_s27 }
 0xf5c   :  { %2893 = vrot.lane.b32.xlu1 %v2871_v42, %s4165_s27 }
 0xf60   :  { %2895 = vrot.lane.b32.xlu1 %v2872_v45, %s4165_s27 }
 0xf64   :  { %3052 = vbcast.lane.b32.xlu1 %v3050_v46, 256  ;;  %v2249_v46 = vadd.f32 1.0, %v4113_v8  ;;  %v2443_v15 = vpop.permute.xlu0 %2442 }
 0xf66   :  { %4114 = vlog2.f32 %v2249_v46 }
 0xf68   :  { %2989 = vbcast.lane.b32.xlu1 %v2987_v5, 256  ;;  %v2571_v54 = vpop.permute.xlu0 %2570 }
 0xf6c   :  { %3059 = vbcast.lane.b32.xlu1 %v3057_v47, 256  ;;  %v3293_v47 = vrot.slane %v4736_v39, 2  ;;  %v4807_v41 = vpop.permute.xlu0 %2577 }
 0xf70   :  { %3045 = vbcast.lane.b32.xlu1 %v3043_v17, 256  ;;  %v4810_v61 = vpop.permute.xlu0 %2584 }
 0xf74   :  { %3073 = vbcast.lane.b32.xlu1 %v3071_v57, 256  ;;  %v4115_v57 = vpop.eup %4114  ;;  %v4814_v6 = vpop.permute.xlu0 %2591 }
 0xf78   :  { %3031 = vbcast.lane.b32.xlu1 %v3029_v58, 256  ;;  %v2251_v58 = vmul.f32 0.6931472, %v4115_v57  ;;  %v4823_v11 = vpop.permute.xlu0 %2598 }
 0xf7c   :  { %3087 = vbcast.lane.b32.xlu1 %v3085_v59, 256  ;;  %v2254_v59 = vmul.f32 %v4113_v8, %v2253_v51  ;;  %v4827_v16 = vpop.permute.xlu0 %2605 }
 0xf7e   :  { %v2257_v14 = vsel %vm2256_vm14, %v2254_v59, %v2251_v58 }
 0xf80   :  { %3094 = vbcast.lane.b32.xlu1 %v3092_v60, 256  ;;  %v2239_v60 = vmax.f32 %v2231_v49, 0.0  ;;  %v4836_v34 = vpop.permute.xlu0 %2612 }
 0xf82   :  { %v2267_v55 = vadd.f32 %v2257_v14, %v2239_v60 }
 0xf84   :  { %3310 = vrot.lane.b32.xlu1 %v3293_v47, %s4165_s27  ;;  %v2445_v56 = vsel %vm2157_vm12, %v2267_v55, %v2443_v15  ;;  %v2439_v21 = vmul.f32 %v2267_v55, %v4600_v2  ;;  %v4843_v23 = vpop.permute.xlu0 %2619 }
 0xf85   :  { %v2459_v63 = vrot.slane %v2445_v56, %v4742_v44  ;;  %v2452_v9 = vcombine.high %v2445_v56, %v2445_v56 }
 0xf86   :  { %v2686_v29 = vrot.slane %v2439_v21, %v4742_v44  ;;  %v2679_v57 = vcombine.high %v2439_v21, %v2439_v21 }
 0xf87   :  { %v2475_v1 = vrot.slane %v2459_v63, %v4742_v44  ;;  %v2467_v20 = vcombine.high %v2459_v63, %v2459_v63  ;;  %v2466_v40 = vrot.slane %v2452_v9, %v4742_v44 }
 0xf88   :  { %3306 = vrot.lane.b32.xlu1 %v4736_v39, %s4165_s27  ;;  %v2702_v42 = vrot.slane %v2686_v29, %v4742_v44  ;;  %v2694_v49 = vcombine.high %v2686_v29, %v2686_v29  ;;  %v4851_v14 = vpop.permute.xlu0 %2996 }
 0xf89   :  { %v2504_v26 = vrot.slane %v2475_v1, %v4630_v62  ;;  %v2489_v13 = vrot.slane %v2467_v20, %v4742_v44  ;;  %v2497_v10 = vcombine.high %v2475_v1, %v2475_v1  ;;  %v2468_v28 = vcombine.high %v2466_v40, %v2466_v40 }
 0xf8a   :  { %v2482_v30 = vrot.slane %v2466_v40, %v4742_v44  ;;  %v2780_v5 = vrot.slane %v2702_v42, %v4630_v62  ;;  %v2716_v0 = vrot.slane %v2694_v49, %v4742_v44  ;;  %v2724_v22 = vcombine.high %v2702_v42, %v2702_v42 }
 0xf8b   :  { %v2541_v4 = vmul.f32 %v2504_v26, %v4820_v7  ;;  %v2508_v12 = vrot.slane %v2489_v13, %v4630_v62  ;;  %v2499_v24 = vcombine.high %v2489_v13, %v2489_v13  ;;  %v2512_v53 = vrot.slane %v2497_v10, %v4630_v62 }
 0xf8c   :  { %3326 = vrot.lane.b32.xlu1 %v3300_v32, %s4165_s27  ;;  %v2496_v37 = vrot.slane %v2468_v28, %v4742_v44  ;;  %v2520_v50 = vrot.slane %v2482_v30, %v4630_v62  ;;  %v2498_v52 = vcombine.high %v2482_v30, %v2482_v30  ;;  %v2857_v47 = vmul.f32 %v2780_v5, %v2571_v54 }
 0xf8d   :  { %v2549_v19 = vmul.f32 1.442695, %v2541_v4  ;;  %v2542_v27 = vmul.f32 %v2508_v12, %v4820_v7  ;;  %v2516_v31 = vrot.slane %v2499_v24, %v4630_v62  ;;  %v2543_v18 = vmul.f32 %v2512_v53, %v4820_v7  ;;  %v4869_v24 = vpop.permute.xlu0 %3003 }
 0xf8e   :  { %v2524_v8 = vrot.slane %v2496_v37, %v4630_v62  ;;  %v2545_v15 = vmul.f32 %v2520_v50, %v4820_v7  ;;  %v2500_v51 = vcombine.high %v2496_v37, %v2496_v37  ;;  %v2528_v43 = vrot.slane %v2498_v52, %v4630_v62 }
 0xf8f   :  { %4116 = vpow2.f32 %v2549_v19  ;;  %v2551_v35 = vmul.f32 1.442695, %v2542_v27  ;;  %v2553_v38 = vmul.f32 1.442695, %v2543_v18  ;;  %v2544_v45 = vmul.f32 %v2516_v31, %v4820_v7 }
 0xf90   :  { %v2784_v58 = vrot.slane %v2716_v0, %v4630_v62  ;;  %v2557_v55 = vmul.f32 1.442695, %v2545_v15  ;;  %v2546_v56 = vmul.f32 %v2524_v8, %v4820_v7  ;;  %v2693_v20 = vrot.slane %v2679_v57, %v4742_v44 }
 0xf91   :  { %4118 = vpow2.f32 %v2551_v35  ;;  %v2555_v46 = vmul.f32 1.442695, %v2544_v45  ;;  %v2532_v25 = vrot.slane %v2500_v51, %v4630_v62  ;;  %v2788_v26 = vrot.slane %v2724_v22, %v4630_v62  ;;  %v3011_v52 = vpop.permute.xlu0 %3010 }
 0xf92   :  { %4120 = vpow2.f32 %v2553_v38  ;;  %v2858_v1 = vmul.f32 %v2784_v58, %v4807_v41  ;;  %v2726_v13 = vcombine.high %v2716_v0, %v2716_v0  ;;  %v2559_v12 = vmul.f32 1.442695, %v2546_v56 }
 0xf93   :  { %4122 = vpow2.f32 %v2555_v46  ;;  %v2547_v19 = vmul.f32 %v2528_v43, %v4820_v7  ;;  %v2859_v40 = vmul.f32 %v2788_v26, %v4810_v61  ;;  %v2709_v27 = vrot.slane %v2693_v20, %v4742_v44 }
 0xf94   :  { %4124 = vpow2.f32 %v2557_v55  ;;  %v2792_v53 = vrot.slane %v2726_v13, %v4630_v62  ;;  %v2695_v28 = vcombine.high %v2693_v20, %v2693_v20  ;;  %v2548_v18 = vmul.f32 %v2532_v25, %v4820_v7 }
 0xf95   :  { %4126 = vpow2.f32 %v2559_v12  ;;  %v2561_v35 = vmul.f32 1.442695, %v2547_v19  ;;  %v2796_v49 = vrot.slane %v2709_v27, %v4630_v62  ;;  %v3018_v43 = vpop.permute.xlu0 %3017  ;;  %v3370_v12 = vld [vmem:[%s5091_s1 + $0x80] sm:$0xff] }
 0xf96   :  { %v2860_v42 = vmul.f32 %v2792_v53, %v4814_v6  ;;  %v2723_v45 = vrot.slane %v2695_v28, %v4742_v44  ;;  %v2563_v0 = vmul.f32 1.442695, %v2548_v18  ;;  %v3373_v28 = vld [vmem:[%s5091_s1 + $0x98] sm:$0xff]  ;;  %v3296_v18 = vrot.slane %v4736_v39, 5 }
 0xf97   :  { %4128 = vpow2.f32 %v2561_v35  ;;  %v2861_v7 = vmul.f32 %v2796_v49, %v4823_v11  ;;  %v3375_v49 = vld [vmem:[%s5091_s1 + $0xa8] sm:$0xff] }
 0xf98   :  { %v2800_v6 = vrot.slane %v2723_v45, %v4630_v62  ;;  %4130 = vpow2.f32 %v2563_v0 }
 0xf99   :  { %v4117_v17 = vpop.eup %4116  ;;  %v4898_v25 = vpop.permute.xlu0 %3066 }
 0xf9a   :  { %v2913_v59 = vmul.f32 0.0, %v4117_v17  ;;  %v2862_v51 = vmul.f32 %v2800_v6, %v4827_v16 }
 0xf9b   :  { %v4119_v54 = vpop.eup %4118 }
 0xf9c   :  { %v4121_v21 = vpop.eup %4120 }
 0xf9d   :  { %v4123_v37 = vpop.eup %4122  ;;  %v4918_v53 = vpop.permute.xlu0 %3024 }
 0xf9e   :  { %v4125_v8 = vpop.eup %4124 }
 0xf9f   :  { %v4127_v57 = vpop.eup %4126 }
 0xfa1   :  { %v4129_v56 = vpop.eup %4128 }
 0xfb6   :  { %v2882_v32 = vpop.permute.xlu1 %2881 }
 0xfb7   :  { %v2905_v60 = vsel %vm2157_vm12, %v2857_v47, %v2882_v32  ;;  %v2725_v47 = vcombine.high %v2709_v27, %v2709_v27  ;;  %v3372_v27 = vld [vmem:[%s5091_s1 + $0x90] sm:$0xff] }
 0xfb8   :  { %v4855_v63 = vadd.f32 %v2913_v59, %v2905_v60  ;;  %v2727_v59 = vcombine.high %v2723_v45, %v2723_v45 }
 0xfb9   :  { %v2804_v11 = vrot.slane %v2725_v47, %v4630_v62 }
 0xfba   :  { %v2884_v4 = vpop.permute.xlu1 %2883  ;;  %v2916_v9 = vmul.f32 %v4119_v54, %v4855_v63  ;;  %2960 = vrot.lane.b32.xlu0 %v4855_v63, %s4165_s27  ;;  %v2808_v16 = vrot.slane %v2727_v59, %v4630_v62  ;;  %v3371_v62 = vld [vmem:[%s5091_s1 + $0x88] sm:$0xff] }
 0xfbb   :  { %v2906_v10 = vsel %vm2157_vm12, %v2858_v1, %v2884_v4  ;;  %v2863_v54 = vmul.f32 %v2804_v11, %v4836_v34  ;;  %v4131_v4 = vpop.eup %4130 }
 0xfbc   :  { %v4866_v41 = vadd.f32 %v2916_v9, %v2906_v10  ;;  %v2864_v9 = vmul.f32 %v2808_v16, %v4843_v23 }
 0xfbe   :  { %v2886_v29 = vpop.permute.xlu1 %2885  ;;  %v2920_v30 = vmul.f32 %v4121_v21, %v4866_v41  ;;  %2962 = vrot.lane.b32.xlu1 %v4866_v41, %s4165_s27  ;;  %v3097_v21 = vmul.f32 %v4851_v14, %v4866_v41  ;;  %v4026_v14 = vpack.c.bf16 %v3373_v28, %v3372_v27 }
 0xfbf   :  { %v2907_v31 = vsel %vm2157_vm12, %v2859_v40, %v2886_v29  ;;  %v4022_v40 = vpack.c.bf16 %v3371_v62, %v3370_v12 }
 0xfc0   :  { %v2921_v61 = vadd.f32 %v2920_v30, %v2907_v31  ;;  %v3119_v35 = vsel %vm2157_vm12, %v3097_v21, 0.0 }
 0xfc1   :  { %4023 = vmatprep.subr.bf16.mxu1 %v4022_v40  ;;  %v3120_v45 = vrot.slane %v3119_v35, 4 }
 0xfc2   :  { %v2888_v50 = vpop.permute.xlu1 %2887  ;;  %v2924_v38 = vmul.f32 %v4123_v37, %v2921_v61  ;;  %2964 = vrot.lane.b32.xlu0 %v2921_v61, %s4165_s27  ;;  %v3098_v41 = vmul.f32 %v4869_v24, %v2921_v61  ;;  %v3301_v37 = vrot.slane %v4739_v48, 3  ;;  %4025 = vmatpush3.bf16.msra.mxu1 %v4022_v40 }
 0xfc3   :  { %v2908_v5 = vsel %vm2157_vm12, %v2860_v42, %v2888_v50  ;;  %4027 = vmatprep.subr.bf16.mxu1 %v4026_v14  ;;  %v3374_v42 = vld [vmem:[%s5091_s1 + $0xa0] sm:$0xff] }
 0xfc4   :  { %v2925_v17 = vadd.f32 %v2924_v38, %v2908_v5  ;;  %v4030_v50 = vpack.c.bf16 %v3375_v49, %v3374_v42  ;;  %v4945_v38 = vpop.permute.xlu0 %3080 }
 0xfc6   :  { %v2890_v46 = vpop.permute.xlu1 %2889  ;;  %v2928_v15 = vmul.f32 %v4125_v8, %v2925_v17  ;;  %2966 = vrot.lane.b32.xlu1 %v2925_v17, %s4165_s27  ;;  %v3099_v29 = vmul.f32 %v3011_v52, %v2925_v17  ;;  %v3126_v52 = vsel %vm2157_vm12, %v3098_v41, 0.0  ;;  %v3297_v17 = vrot.slane %v4736_v39, 6  ;;  %4029 = vmatpush3.bf16.msra.mxu1 %v4026_v14 }
 0xfc7   :  { %v2909_v22 = vsel %vm2157_vm12, %v2861_v7, %v2890_v46  ;;  %v3302_v8 = vrot.slane %v4739_v48, 4  ;;  %4031 = vmatprep.subr.bf16.mxu1 %v4030_v50  ;;  %v3376_v46 = vld [vmem:[%s5091_s1 + $0xb0] sm:$0xff]  ;;  %v3127_v6 = vrot.slane %v3126_v52, 4 }
 0xfc8   :  { %v2929_v44 = vadd.f32 %v2928_v15, %v2909_v22  ;;  %v3133_v24 = vsel %vm2157_vm12, %v3099_v29, 0.0  ;;  %v3377_v15 = vld [vmem:[%s5091_s1 + $0xb8] sm:$0xff] }
 0xfc9   :  { %v3134_v7 = vrot.slane %v3133_v24, 4 }
 0xfca   :  { %v2892_v58 = vpop.permute.xlu1 %2891  ;;  %v2932_v32 = vmul.f32 %v4127_v57, %v2929_v44  ;;  %2968 = vrot.lane.b32.xlu1 %v2929_v44, %s4165_s27  ;;  %v3100_v31 = vmul.f32 %v3018_v43, %v2929_v44  ;;  %v4034_v44 = vpack.c.bf16 %v3377_v15, %v3376_v46  ;;  %v3121_v57 = vadd.f32 %v3120_v45, %v3119_v35 }
 0xfcb   :  { %v2910_v60 = vsel %vm2157_vm12, %v2862_v51, %v2892_v58  ;;  %v3298_v51 = vrot.slane %v4736_v39, 7  ;;  %v3303_v43 = vrot.slane %v4739_v48, 5  ;;  %4033 = vmatpush3.bf16.msra.mxu1 %v4030_v50  ;;  %v4965_v58 = vpop.permute.xlu0 %3038  ;;  %v3304_v39 = vrot.slane %v4739_v48, 6 }
 0xfcc   :  { %v4891_v55 = vadd.f32 %v2932_v32, %v2910_v60  ;;  %v3140_v5 = vsel %vm2157_vm12, %v3100_v31, 0.0  ;;  %v3135_v32 = vadd.f32 %v3134_v7, %v3133_v24  ;;  %4035 = vmatprep.subr.bf16.mxu1 %v4034_v44 }
 0xfcd   :  { %v3141_v47 = vrot.slane %v3140_v5, 4 }
 0xfce   :  { %v2894_v1 = vpop.permute.xlu1 %2893  ;;  %v2936_v20 = vmul.f32 %v4129_v56, %v4891_v55  ;;  %2970 = vrot.lane.b32.xlu0 %v4891_v55, %s4165_s27  ;;  %v3128_v56 = vadd.f32 %v3127_v6, %v3126_v52 }
 0xfcf   :  { %v2911_v26 = vsel %vm2157_vm12, %v2863_v54, %v2894_v1  ;;  %v3142_v59 = vadd.f32 %v3141_v47, %v3140_v5  ;;  %v3122_v54 = vrot.slane %v3121_v57, 2  ;;  %v3305_v1 = vrot.slane %v4739_v48, 7  ;;  %4037 = vmatpush3.bf16.msra.mxu1 %v4034_v44 }
 0xfd0   :  { %v4901_v13 = vadd.f32 %v2936_v20, %v2911_v26  ;;  %v3136_v20 = vrot.slane %v3135_v32, 2 }
 0xfd1   :  { %v3143_v26 = vrot.slane %v3142_v59, 2 }
 0xfd2   :  { %v2896_v10 = vpop.permute.xlu1 %2895  ;;  %v2940_v34 = vmul.f32 %v4131_v4, %v4901_v13  ;;  %2972 = vrot.lane.b32.xlu1 %v4901_v13, %s4165_s27  ;;  %v3137_v12 = vadd.f32 %v3136_v20, %v3135_v32 }
 0xfd3   :  { %v2912_v19 = vsel %vm2157_vm12, %v2864_v9, %v2896_v10  ;;  %v3129_v9 = vrot.slane %v3128_v56, 2  ;;  %v3309_v10 = vpop.permute.xlu0 %3308 }
 0xfd4   :  { %v4916_v23 = vadd.f32 %v2940_v34, %v2912_v19  ;;  %v3123_v34 = vadd.f32 %v3122_v54, %v3121_v57  ;;  %v3224_v19 = vld [vmem:[%s5092_s2 + $0xa8] sm:$0xff]  ;;  %v3138_v14 = vrot.slane %v3137_v12, 1 }
 0xfd5   :  { %v3130_v40 = vadd.f32 %v3129_v9, %v3128_v56  ;;  %v4981_v28 = vmul.f32 %v3224_v19, %v4600_v2  ;;  %v3101_v9 = vmul.f32 %v4918_v53, %v4891_v55 }
 0xfd6   :  { %v4926_v30 = vpop.permute.xlu1 %3052  ;;  %3322 = vrot.lane.b32.xlu1 %v4739_v48, %s4165_s27  ;;  %2974 = vrot.lane.b32.xlu0 %v4916_v23, %s4165_s27  ;;  %v3144_v48 = vadd.f32 %v3143_v26, %v3142_v59  ;;  %v3124_v27 = vrot.slane %v3123_v34, 1  ;;  %v3139_v42 = vadd.f32 %v3138_v14, %v3137_v12 }
 0xfd7   :  { %v4983_v29 = vpop.permute.xlu0 %3324  ;;  %v3230_v49 = vrot.slane %v4981_v28, 1  ;;  %v3232_v2 = vrot.slane %v4981_v28, 3  ;;  %v3147_v12 = vsel %vm2157_vm12, %v3101_v9, 0.0 }
 0xfd8   :  { %v3145_v31 = vrot.slane %v3144_v48, 1  ;;  %v3148_v14 = vrot.slane %v3147_v12, 4 }
 0xfda   :  { %v2990_v61 = vpop.permute.xlu1 %2989  ;;  %3316 = vrot.lane.b32.xlu1 %v3296_v18, %s4165_s27  ;;  %3328 = vrot.lane.b32.xlu0 %v3301_v37, %s4165_s27  ;;  %v3131_v18 = vrot.slane %v3130_v40, 1  ;;  %v3125_v37 = vadd.f32 %v3124_v27, %v3123_v34  ;;  %v3103_v27 = vmul.f32 %v4965_v58, %v4916_v23 }
 0xfdb   :  { %v3096_v0 = vmul.f32 %v2990_v61, %v4855_v63  ;;  %v3146_v61 = vadd.f32 %v3145_v31, %v3144_v48  ;;  %v3313_v52 = vpop.permute.xlu0 %3312 }
 0xfdc   :  { %v3132_v45 = vadd.f32 %v3131_v18, %v3130_v40  ;;  %v3261_v5 = vadd.f32 %v3230_v49, %v3125_v37 }
 0xfdd   :  { %v3112_v22 = vsel %vm2157_vm12, %v3096_v0, 0.0  ;;  %v3231_v0 = vrot.slane %v4981_v28, 2 }
 0xfde   :  { %v4959_v63 = vpop.permute.xlu1 %3059  ;;  %3318 = vrot.lane.b32.xlu1 %v3297_v17, %s4165_s27  ;;  %3330 = vrot.lane.b32.xlu0 %v3302_v8, %s4165_s27  ;;  %v3113_v11 = vrot.slane %v3112_v22, 4  ;;  %v3233_v17 = vrot.slane %v4981_v28, 4  ;;  %v3263_v8 = vadd.f32 %v3232_v2, %v3139_v42  ;;  %v3355_v47 = vmul.f32 %v3309_v10, %v3261_v5 }
 0xfdf   :  { %v3262_v15 = vadd.f32 %v3231_v0, %v3132_v45  ;;  %v3315_v44 = vpop.permute.xlu0 %3314  ;;  %v3149_v42 = vadd.f32 %v3148_v14, %v3147_v12  ;;  %v3225_v45 = vld [vmem:[%s5092_s2 + $0xb0] sm:$0xff] }
 0xfe0   :  { %v3114_v16 = vadd.f32 %v3113_v11, %v3112_v22  ;;  %v3264_v6 = vadd.f32 %v3233_v17, %v3146_v61  ;;  %v3394_v59 = vrot.slane %v3355_v47, 7 }
 0xfe1   :  { %v3150_v0 = vrot.slane %v3149_v42, 2 }
 0xfe2   :  { %v4967_v60 = vpop.permute.xlu1 %3045  ;;  %3320 = vrot.lane.b32.xlu1 %v3298_v51, %s4165_s27  ;;  %3332 = vrot.lane.b32.xlu0 %v3303_v43, %s4165_s27  ;;  %v3115_v62 = vrot.slane %v3114_v16, 2  ;;  %v3357_v51 = vmul.f32 %v3313_v52, %v3263_v8  ;;  %v3358_v32 = vmul.f32 %v3315_v44, %v3264_v6 }
 0xfe4   :  { %v3116_v41 = vadd.f32 %v3115_v62, %v3114_v16  ;;  %v3403_v20 = vrot.slane %v3358_v32, 4 }
 0xfe6   :  { %v4973_v4 = vpop.permute.xlu1 %3073  ;;  %3336 = vrot.lane.b32.xlu1 %v3305_v1, %s4165_s27  ;;  %3334 = vrot.lane.b32.xlu0 %v3304_v39, %s4165_s27  ;;  %v3117_v24 = vrot.slane %v3116_v41, 1  ;;  %v3400_v1 = vrot.slane %v3357_v51, 5  ;;  %v3151_v51 = vadd.f32 %v3150_v0, %v3149_v42 }
 0xfe8   :  { %v3118_v7 = vadd.f32 %v3117_v24, %v3116_v41 }
 0xfea   :  { %v3032_v21 = vpop.permute.xlu1 %3031  ;;  %v3260_v57 = vadd.f32 %v4981_v28, %v3118_v7 }
 0xfeb   :  { %v3102_v62 = vmul.f32 %v3032_v21, %v4901_v13  ;;  %v3161_v13 = vsel %vm2157_vm12, %v3103_v27, 0.0 }
 0xfec   :  { %v3162_v24 = vrot.slane %v3161_v13, 4 }
 0xfed   :  { %v3154_v55 = vsel %vm2157_vm12, %v3102_v62, 0.0  ;;  %v3152_v62 = vrot.slane %v3151_v51, 1 }
 0xfee   :  { %v4985_v35 = vpop.permute.xlu1 %3087 }
 0xff2   :  { %v4988_v50 = vpop.permute.xlu1 %3094 }
 0xff6   :  { %v3311_v46 = vpop.permute.xlu1 %3310 }
 0xff7   :  { %v3356_v22 = vmul.f32 %v3311_v46, %v3262_v15  ;;  %v5022_v46 = vmul.f32 %v3225_v45, %v4602_v3  ;;  %v3163_v15 = vadd.f32 %v3162_v24, %v3161_v13  ;;  %v3236_v13 = vrot.slane %v4981_v28, 7 }
 0xff9   :  { %v3397_v56 = vrot.slane %v3356_v22, 6 }
 0xffa   :  { %v3307_v43 = vpop.permute.xlu1 %3306 }
 0xffb   :  { %v3354_v11 = vmul.f32 %v3307_v43, %v3260_v57 }
 0xffd   :  { %v3396_v54 = vsel %vm3395_vm15, %v3394_v59, %v3354_v11 }
 0xffe   :  { %v3399_v39 = vsel %vm3398_vm1, %v3397_v56, %v3396_v54  ;;  %v5002_v10 = vpop.permute.xlu1 %3326  ;;  %v3237_v56 = vrot.slane %v5022_v46, 1  ;;  %v3238_v54 = vrot.slane %v5022_v46, 2 }
 0xfff   :  { %v3402_v16 = vsel %vm3401_vm2, %v3400_v1, %v3399_v39  ;;  %v3164_v1 = vrot.slane %v3163_v15, 2 }
0x1000   :  { %v4998_v26 = vsel %vm3404_vm3, %v3403_v20, %v3402_v16  ;;  %v3234_v20 = vrot.slane %v4981_v28, 5  ;;  %v3239_v16 = vrot.slane %v5022_v46, 3 }
0x102c   :  { %v2961_v34 = vpop.permute.xlu0 %2960 }
0x102d   :  { %v3104_v19 = vmul.f32 %v4967_v60, %v2961_v34  ;;  %v3155_v60 = vrot.slane %v3154_v55, 4 }
0x102f   :  { %v3168_v53 = vsel %vm2157_vm12, %v3104_v19, 0.0  ;;  %v3156_v2 = vadd.f32 %v3155_v60, %v3154_v55  ;;  %v3240_v55 = vrot.slane %v5022_v46, 4 }
0x1030   :  { %v2963_v48 = vpop.permute.xlu1 %2962  ;;  %v3169_v21 = vrot.slane %v3168_v53, 4 }
0x1031   :  { %v3105_v40 = vmul.f32 %v4926_v30, %v2963_v48  ;;  %v3157_v22 = vrot.slane %v3156_v2, 2 }
0x1033   :  { %v3175_v41 = vsel %vm2157_vm12, %v3105_v40, 0.0  ;;  %v3158_v9 = vadd.f32 %v3157_v22, %v3156_v2 }
0x1034   :  { %v3176_v31 = vrot.slane %v3175_v41, 4  ;;  %v2965_v18 = vpop.permute.xlu0 %2964 }
0x1035   :  { %v3106_v37 = vmul.f32 %v4959_v63, %v2965_v18  ;;  %v3170_v63 = vadd.f32 %v3169_v21, %v3168_v53  ;;  %v3165_v53 = vadd.f32 %v3164_v1, %v3163_v15  ;;  %v3159_v42 = vrot.slane %v3158_v9, 1 }
0x1036   :  { %v3177_v49 = vadd.f32 %v3176_v31, %v3175_v41 }
0x1037   :  { %v3182_v30 = vsel %vm2157_vm12, %v3106_v37, 0.0  ;;  %v3171_v44 = vrot.slane %v3170_v63, 2  ;;  %v3166_v2 = vrot.slane %v3165_v53, 1  ;;  %v3160_v15 = vadd.f32 %v3159_v42, %v3158_v9 }
0x1038   :  { %v3183_v23 = vrot.slane %v3182_v30, 4  ;;  %v2967_v58 = vpop.permute.xlu1 %2966  ;;  %v3178_v17 = vrot.slane %v3177_v49, 2 }
0x1039   :  { %v3107_v61 = vmul.f32 %v4898_v25, %v2967_v58  ;;  %v3172_v34 = vadd.f32 %v3171_v44, %v3170_v63  ;;  %v3241_v63 = vrot.slane %v5022_v46, 5 }
0x103a   :  { %v3184_v52 = vadd.f32 %v3183_v23, %v3182_v30  ;;  %v3179_v43 = vadd.f32 %v3178_v17, %v3177_v49  ;;  %v3153_v30 = vadd.f32 %v3152_v62, %v3151_v51 }
0x103b   :  { %v3189_v5 = vsel %vm2157_vm12, %v3107_v61, 0.0  ;;  %v3173_v21 = vrot.slane %v3172_v34, 1 }
0x103c   :  { %v3190_v8 = vrot.slane %v3189_v5, 4  ;;  %v2969_v7 = vpop.permute.xlu1 %2968  ;;  %v3185_v25 = vrot.slane %v3184_v52, 2  ;;  %v3180_v19 = vrot.slane %v3179_v43, 1 }
0x103d   :  { %v3108_v6 = vmul.f32 %v4973_v4, %v2969_v7  ;;  %v3174_v17 = vadd.f32 %v3173_v21, %v3172_v34  ;;  %v3265_v7 = vadd.f32 %v3234_v20, %v3153_v30  ;;  %v3243_v30 = vrot.slane %v5022_v46, 7 }
0x103e   :  { %v3191_v47 = vadd.f32 %v3190_v8, %v3189_v5  ;;  %v3186_v39 = vadd.f32 %v3185_v25, %v3184_v52  ;;  %v3181_v49 = vadd.f32 %v3180_v19, %v3179_v43  ;;  %v3167_v43 = vadd.f32 %v3166_v2, %v3165_v53 }
0x103f   :  { %v3196_v57 = vsel %vm2157_vm12, %v3108_v6, 0.0  ;;  %v3268_v1 = vadd.f32 %v5022_v46, %v3174_v17 }
0x1040   :  { %v3192_v32 = vrot.slane %v3191_v47, 2  ;;  %v3197_v11 = vrot.slane %v3196_v57, 4  ;;  %v2971_v59 = vpop.permute.xlu0 %2970  ;;  %v3187_v31 = vrot.slane %v3186_v39, 1  ;;  %v3269_v6 = vadd.f32 %v3237_v56, %v3181_v49 }
0x1041   :  { %v3109_v3 = vmul.f32 %v4945_v38, %v2971_v59  ;;  %v3235_v38 = vrot.slane %v4981_v28, 6 }
0x1042   :  { %v3198_v4 = vadd.f32 %v3197_v11, %v3196_v57  ;;  %v3193_v48 = vadd.f32 %v3192_v32, %v3191_v47  ;;  %v3188_v5 = vadd.f32 %v3187_v31, %v3186_v39  ;;  %v3363_v56 = vmul.f32 %v4983_v29, %v3269_v6 }
0x1043   :  { %v3203_v12 = vsel %vm2157_vm12, %v3109_v3, 0.0 }
0x1044   :  { %v3199_v40 = vrot.slane %v3198_v4, 2  ;;  %v3204_v27 = vrot.slane %v3203_v12, 4  ;;  %v2973_v14 = vpop.permute.xlu1 %2972  ;;  %v3194_v61 = vrot.slane %v3193_v48, 1  ;;  %v3270_v11 = vadd.f32 %v3238_v54, %v3188_v5 }
0x1045   :  { %v3110_v41 = vmul.f32 %v4985_v35, %v2973_v14 }
0x1046   :  { %v3200_v18 = vadd.f32 %v3199_v40, %v3198_v4  ;;  %v3205_v37 = vadd.f32 %v3204_v27, %v3203_v12  ;;  %v3195_v44 = vadd.f32 %v3194_v61, %v3193_v48  ;;  %v3266_v4 = vadd.f32 %v3235_v38, %v3160_v15 }
0x1047   :  { %v3210_v60 = vsel %vm2157_vm12, %v3110_v41, 0.0  ;;  %v3267_v27 = vadd.f32 %v3236_v13, %v3167_v43  ;;  %v3364_v14 = vmul.f32 %v5002_v10, %v3270_v11  ;;  %v3242_v13 = vrot.slane %v5022_v46, 6 }
0x1048   :  { %v3206_v23 = vrot.slane %v3205_v37, 2  ;;  %v3211_v58 = vrot.slane %v3210_v60, 4  ;;  %v3323_v24 = vpop.permute.xlu1 %3322  ;;  %v2975_v35 = vpop.permute.xlu0 %2974  ;;  %v3201_v52 = vrot.slane %v3200_v18, 1  ;;  %v3271_v34 = vadd.f32 %v3239_v16, %v3195_v44 }
0x1049   :  { %v3111_v45 = vmul.f32 %v4988_v50, %v2975_v35  ;;  %v3362_v41 = vmul.f32 %v3323_v24, %v3268_v1  ;;  %v3417_v24 = vrot.slane %v3364_v14, 6  ;;  %v3512_v14 = vld [vmem:[%s5091_s1 + $0x130] sm:$0xff] }
0x104a   :  { %v3207_v0 = vadd.f32 %v3206_v23, %v3205_v37  ;;  %v3212_v28 = vadd.f32 %v3211_v58, %v3210_v60  ;;  %v3202_v51 = vadd.f32 %v3201_v52, %v3200_v18  ;;  %v3415_v60 = vrot.slane %v3363_v56, 7 }
0x104b   :  { %v3217_v8 = vsel %vm2157_vm12, %v3111_v45, 0.0 }
0x104c   :  { %v3213_v25 = vrot.slane %v3212_v28, 2  ;;  %v3218_v47 = vrot.slane %v3217_v8, 4  ;;  %v3317_v22 = vpop.permute.xlu1 %3316  ;;  %v3329_v57 = vpop.permute.xlu0 %3328  ;;  %v3208_v32 = vrot.slane %v3207_v0, 1  ;;  %v3272_v54 = vadd.f32 %v3240_v55, %v3202_v51 }
0x104d   :  { %v3359_v50 = vmul.f32 %v3317_v22, %v3265_v7  ;;  %v3365_v31 = vmul.f32 %v3329_v57, %v3271_v34  ;;  %v3416_v10 = vsel %vm3395_vm15, %v3415_v60, %v3362_v41 }
0x104e   :  { %v3214_v59 = vadd.f32 %v3213_v25, %v3212_v28  ;;  %v3219_v3 = vadd.f32 %v3218_v47, %v3217_v8  ;;  %v3209_v20 = vadd.f32 %v3208_v32, %v3207_v0  ;;  %v3418_v0 = vsel %vm3398_vm1, %v3417_v24, %v3416_v10 }
0x104f   :  { %v3406_v39 = vrot.slane %v3359_v50, 3  ;;  %v3419_v23 = vrot.slane %v3365_v31, 5  ;;  %v3511_v31 = vld [vmem:[%s5091_s1 + $0x128] sm:$0xff] }
0x1050   :  { %v3220_v9 = vrot.slane %v3219_v3, 2  ;;  %v3319_v12 = vpop.permute.xlu1 %3318  ;;  %v3331_v62 = vpop.permute.xlu0 %3330  ;;  %v3215_v19 = vrot.slane %v3214_v59, 1  ;;  %v3273_v37 = vadd.f32 %v3241_v63, %v3209_v20 }
0x1051   :  { %v3408_v48 = vsel %vm3407_vm4, %v3406_v39, %v4998_v26  ;;  %v3360_v40 = vmul.f32 %v3319_v12, %v3266_v4  ;;  %v3366_v18 = vmul.f32 %v3331_v62, %v3272_v54  ;;  %v3420_v46 = vsel %vm3401_vm2, %v3419_v23, %v3418_v0  ;;  %v3510_v54 = vld [vmem:[%s5091_s1 + $0x120] sm:$0xff] }
0x1052   :  { %v3221_v53 = vadd.f32 %v3220_v9, %v3219_v3  ;;  %v3216_v29 = vadd.f32 %v3215_v19, %v3214_v59 }
0x1053   :  { %v3409_v38 = vrot.slane %v3360_v40, 2  ;;  %v3421_v35 = vrot.slane %v3366_v18, 4 }
0x1054   :  { %v3321_v16 = vpop.permute.xlu1 %3320  ;;  %v3333_v21 = vpop.permute.xlu0 %3332  ;;  %v3222_v42 = vrot.slane %v3221_v53, 1  ;;  %v3274_v45 = vadd.f32 %v3242_v13, %v3216_v29 }
0x1055   :  { %v3411_v26 = vsel %vm3410_vm5, %v3409_v38, %v3408_v48  ;;  %v3361_v49 = vmul.f32 %v3321_v16, %v3267_v27  ;;  %v3367_v55 = vmul.f32 %v3333_v21, %v3273_v37  ;;  %v3422_v7 = vsel %vm3404_vm3, %v3421_v35, %v3420_v46  ;;  %v3513_v37 = vld [vmem:[%s5091_s1 + $0x138] sm:$0xff] }
0x1056   :  { %v3223_v58 = vadd.f32 %v3222_v42, %v3221_v53 }
0x1057   :  { %v3412_v61 = vrot.slane %v3361_v49, 1  ;;  %v3423_v52 = vrot.slane %v3367_v55, 3 }
0x1058   :  { %v3337_v2 = vpop.permute.xlu1 %3336  ;;  %v3275_v63 = vadd.f32 %v3243_v30, %v3223_v58  ;;  %v3335_v5 = vpop.permute.xlu0 %3334 }
0x1059   :  { %v3368_v28 = vmul.f32 %v3335_v5, %v3274_v45  ;;  %v3414_v17 = vsel %vm3413_vm6, %v3412_v61, %v3411_v26  ;;  %v3424_v6 = vsel %vm3407_vm4, %v3423_v52, %v3422_v7 }
0x105a   :  { %v3369_v8 = vmul.f32 %v3337_v2, %v3275_v63  ;;  %3939 = vmatprep.mubr.msk.f32.mxu1 %vm2157_vm12, %v3414_v17 }
0x105b   :  { %v3425_v15 = vrot.slane %v3368_v28, 2 }
0x105c   :  { %v3427_v25 = vrot.slane %v3369_v8, 1 }
0x105d   :  { %v3426_v47 = vsel %vm3410_vm5, %v3425_v15, %v3424_v6 }
0x105e   :  { %v3428_v22 = vsel %vm3413_vm6, %v3427_v25, %v3426_v47 }
0x105f   :  { %3940 = vmatmul.mubr.msk.f32.vlgmr.msra.gmra.mrb[26].mxu1 %vm2157_vm12, %v3428_v22 }
0x1132   :  { %v3941_v44 = vpop.f32.mrb[26].mxu1 }
0x1133   :  { %v3509_v57 = vadd.f32 %v3941_v44, %v4484_v36  ;;  %v3499_v50 = vpop.f32.mrb[27].mxu1 }
0x1134   :  { %v3508_v51 = vadd.f32 %v3499_v50, %v4477_v33 }
0x1135   :  { %v3517_v43 = vsel %vm29_vm0, %v3509_v57, 0.0 }
0x1136   :  { %3518 = vadd.xlane.f32.xlu1 %v3517_v43  ;;  %v3514_v32 = vsel %vm29_vm0, %v3508_v51, 0.0 }
0x1137   :  { %3515 = vadd.xlane.f32.xlu0 %v3514_v32 }
0x11c3   :  { %v3519_v11 = vpop.xlane.xlu1 %3518 }
0x11c4   :  { %v3521_v59 = vmul.f32 0.03125, %v3519_v11  ;;  %v3516_v3 = vpop.xlane.xlu0 %3515 }
0x11c5   :  { %v3520_v1 = vmul.f32 0.03125, %v3516_v3 }
0x11c6   :  { %v3523_v39 = vsub.f32 %v3509_v57, %v3521_v59 }
0x11c7   :  { %v3522_v4 = vsub.f32 %v3508_v51, %v3520_v1 }
0x11c8   :  { %v3525_v9 = vmul.f32 %v3523_v39, %v3523_v39 }
0x11c9   :  { %v3524_v20 = vmul.f32 %v3522_v4, %v3522_v4 }
0x11ca   :  { %v3529_v36 = vsel %vm29_vm0, %v3525_v9, 0.0 }
0x11cb   :  { %v3526_v56 = vsel %vm29_vm0, %v3524_v20, 0.0 }
0x11cc   :  { %3527 = vadd.xlane.f32.xlu0 %v3526_v56 }
0x11d0   :  { %3530 = vadd.xlane.f32.xlu0 %v3529_v36 }
0x1259   :  { %v3528_v33 = vpop.xlane.xlu0 %3527 }
0x125a   :  { %v3532_v34 = vmul.f32 0.03125, %v3528_v33 }
0x125c   :  { %v3534_v12 = vadd.f32 1e-05, %v3532_v34 }
0x125d   :  { %v3531_v62 = vpop.xlane.xlu0 %3530 }
0x125e   :  { %4132 = vrsqrt.f32 %v3534_v12  ;;  %v3533_v19 = vmul.f32 0.03125, %v3531_v62 }
0x1260   :  { %v3535_v48 = vadd.f32 1e-05, %v3533_v19 }
0x1262   :  { %4134 = vrsqrt.f32 %v3535_v48 }
0x1268   :  { %v4133_v40 = vpop.eup %4132 }
0x1269   :  { %v3538_v27 = vmul.f32 %v4133_v40, %v3522_v4 }
0x126b   :  { %v3540_v41 = vmul.f32 %v3538_v27, %v3510_v54 }
0x126c   :  { %v4135_v53 = vpop.eup %4134 }
0x126d   :  { %v3539_v38 = vmul.f32 %v4135_v53, %v3523_v39  ;;  %v3542_v18 = vadd.f32 %v3540_v41, %v3512_v14 }
0x126f   :  { %v3541_v29 = vmul.f32 %v3539_v38, %v3511_v31  ;;  %3544 = vst.msk [vmem:[#allocation3] sm:$0xff] %vm29_vm0, %v3542_v18 }
0x1271   :  { %v3543_v60 = vadd.f32 %v3541_v29, %v3513_v37 }
0x1273   :  { %3545 = vst.msk [vmem:[#allocation3 + $0x8] sm:$0xff] %vm29_vm0, %v3543_v60 }
0x1274   :  { %4147 = shalt.err (!%p4144_p4)
}
0x1275   :  { %s4148_s1 = scalar_lea.hbm %s5095_s5, 256 }
0x1276   :  { %p4149_p5 = scmp.ne.s32.totalorder %s5095_s5, %s4148_s1  ;;  %p4152_p6 = scmp.lt.u32.totalorder %s4148_s1, %s5095_s5 }
0x1278   :  { %p4154_p7 = pnand %p4152_p6, %p4149_p5 }
0x127a   :  { %4157 = shalt.err (!%p4154_p7)
}
0x127b   :  { %s4168_s12 = smov 128   ;;  %s4169_s13 = smov 8  }
0x127c   :  { %3557 = dma.vmem_to_hbm [thread:$0]  %s3552_s30, 256, %s5095_s5, [#allocation4], %s4168_s12, %s4168_s12, %s4169_s13  }
0x127d   :  { %4158 = dma.done.wait [#allocation4], 256  }
0x127e   :  { %4159 = vsyncadd [#allocation4], 4294967040 }
0x127f   :  { %3561 = vsyncpa [#allocation4], 1 }

</bundles_post_ra>
